<compile_context>
chip_gen: v6e
topology: v6e:2x2x1
jax: 0.10.0
libtpu: 0.0.40
codegen_flags: <defaults>
</compile_context>

<pallas_src>
import functools

import jax
import jax.numpy as jnp
import numpy as np
from jax.experimental import pallas as pl
from jax.experimental.pallas import tpu as pltpu


def _leaky(v):
    # LeakyReLU(0.2): max(v, 0.2*v) is exact for both signs.
    return jnp.maximum(v, 0.2 * v)


def _rcbup_kernel(x_ref, wb1_ref, wb2_ref, wh1_ref, wh2_ref, wm_ref, wa1_ref,
                  wa2_ref, o_ref, *, c, h, w):
    hw = h * w
    pad = w + 1

    x = x_ref[0]  # (C, HW) f32, one batch element, lane-dense spatial axis.

    # Column-validity masks for horizontal taps (computed once, hoisted).
    col = jax.lax.broadcasted_iota(jnp.int32, (1, hw), 1) % w
    m_left = (col > 0).astype(jnp.float32)        # tap reads x-1: invalid at x == 0
    m_right = (col < w - 1).astype(jnp.float32)   # tap reads x+1: invalid at x == W-1
    zpad = jnp.zeros((c, pad), jnp.float32)

    def conv3x3(a, w9):
        # a: (C, HW); w9: (Cout, 9*C), taps ordered (dy, dx) row-major, channel minor.
        # Zero-pad the flat spatial axis once; every tap is a static lane slice.
        # Row over/underflow lands in the zero pad; column wrap is masked.
        ap = jnp.concatenate([zpad, a, zpad], axis=1)      # (C, HW + 2*(W+1))
        taps = []
        for dy in (-1, 0, 1):
            for dx in (-1, 0, 1):
                s = pad + dy * w + dx
                t = ap[:, s:s + hw]
                if dx == -1:
                    t = t * m_left
                elif dx == 1:
                    t = t * m_right
                taps.append(t)
        stacked = jnp.concatenate(taps, axis=0)            # (9*C, HW)
        return jnp.dot(w9, stacked, preferred_element_type=jnp.float32)

    # --- body: conv3x3 -> lrelu -> conv3x3 -> lrelu --------------------------
    b = _leaky(conv3x3(x, wb1_ref[...]))
    b = _leaky(conv3x3(b, wb2_ref[...]))

    # --- ContextBlock head (groups=2 folded into block-diagonal weights) -----
    hh = _leaky(conv3x3(b, wh1_ref[...]))
    hh = conv3x3(hh, wh2_ref[...])

    # --- ContextBlock modeling: softmax attention pooling over H*W -----------
    scores = jnp.sum(hh * wm_ref[...], axis=0, keepdims=True)           # (1, HW)
    smax = jnp.max(scores, axis=1, keepdims=True)
    e = jnp.exp(scores - smax)
    probs = e / jnp.sum(e, axis=1, keepdims=True)                        # (1, HW)
    ctx = jnp.sum(hh * probs, axis=1, keepdims=True)                     # (C, 1)

    # --- channel_add_conv: 1x1 -> lrelu -> 1x1 on the (C, 1) context ---------
    t = _leaky(jnp.dot(wa1_ref[...], ctx, preferred_element_type=jnp.float32))
    add = jnp.dot(wa2_ref[...], t, preferred_element_type=jnp.float32)   # (C, 1)

    gc = b + _leaky(hh + add)                        # ContextBlock output
    o_ref[0] = (x + _leaky(gc)).astype(o_ref.dtype)  # RCBup_L residual


def _grouped_to_dense(wg, groups):
    """PyTorch grouped-conv weight (Cout, Cin/groups, kh, kw) -> dense block-diag."""
    c_out, cig, kh, kw = wg.shape
    og = c_out // groups
    dense = jnp.zeros((c_out, cig * groups, kh, kw), wg.dtype)
    for g in range(groups):
        dense = dense.at[g * og:(g + 1) * og, g * cig:(g + 1) * cig].set(
            wg[g * og:(g + 1) * og])
    return dense


def _to_tap_matrix(w_dense):
    """(Cout, Cin, 3, 3) -> (Cout, 9*Cin): tap (ky,kx) row-major, channel minor."""
    c_out, c_in, kh, kw = w_dense.shape
    return jnp.transpose(w_dense, (0, 2, 3, 1)).reshape(c_out, kh * kw * c_in)


def make_rcbup_params(n_feat, seed=0, groups=1):
    """Deterministic weights matching RCBup_L(n_feat, bias=False, groups=groups)."""
    assert n_feat % 2 == 0, "ContextBlock head uses groups=2"
    key = jax.random.PRNGKey(seed)
    ks = jax.random.split(key, 7)

    def conv_w(k, c_out, c_in_per_group, ksz):
        bound = 1.0 / np.sqrt(c_in_per_group * ksz * ksz)   # kaiming-uniform-ish
        return jax.random.uniform(k, (c_out, c_in_per_group, ksz, ksz),
                                  jnp.float32, -bound, bound)

    p = {
        "groups": groups,
        "wb1": conv_w(ks[0], n_feat, n_feat // groups, 3),   # body conv1
        "wb2": conv_w(ks[1], n_feat, n_feat // groups, 3),   # body conv2
        "wh1": conv_w(ks[2], n_feat, n_feat // 2, 3),        # head conv1 (groups=2)
        "wh2": conv_w(ks[3], n_feat, n_feat // 2, 3),        # head conv2 (groups=2)
        "wm":  conv_w(ks[4], 1, n_feat, 1),                  # conv_mask 1x1
        "wa1": conv_w(ks[5], n_feat, n_feat, 1),             # channel_add conv1
        "wa2": conv_w(ks[6], n_feat, n_feat, 1),             # channel_add conv2
    }
    # Kernel-side formats (layout plumbing done once in the wrapper, not in-kernel).
    p["wb1_tap"] = _to_tap_matrix(_grouped_to_dense(p["wb1"], groups))
    p["wb2_tap"] = _to_tap_matrix(_grouped_to_dense(p["wb2"], groups))
    p["wh1_tap"] = _to_tap_matrix(_grouped_to_dense(p["wh1"], 2))
    p["wh2_tap"] = _to_tap_matrix(_grouped_to_dense(p["wh2"], 2))
    p["wm_col"] = p["wm"].reshape(1, n_feat).T               # (C, 1)
    p["wa1_mat"] = p["wa1"].reshape(n_feat, n_feat)
    p["wa2_mat"] = p["wa2"].reshape(n_feat, n_feat)
    return p


def rcbup_forward(x, params):
    """RCBup_L.forward as a single fused Pallas call. x: (N, C, H, W) float32."""
    n, c, h, w = x.shape
    hw = h * w
    x_flat = x.reshape(n, c, hw)   # lane-dense spatial axis (free reshape)

    kernel = functools.partial(_rcbup_kernel, c=c, h=h, w=w)
    full = lambda b: (0, 0)        # weights: same (whole-array) block every step

    out = pl.pallas_call(
        kernel,
        out_shape=jax.ShapeDtypeStruct((n, c, hw), x.dtype),
        grid_spec=pltpu.PrefetchScalarGridSpec(
            num_scalar_prefetch=0,
            grid=(n,),
            in_specs=[
                pl.BlockSpec((1, c, hw), lambda b: (b, 0, 0)),
                pl.BlockSpec((c, 9 * c), full),
                pl.BlockSpec((c, 9 * c), full),
                pl.BlockSpec((c, 9 * c), full),
                pl.BlockSpec((c, 9 * c), full),
                pl.BlockSpec((c, 1), full),
                pl.BlockSpec((c, c), full),
                pl.BlockSpec((c, c), full),
            ],
            out_specs=pl.BlockSpec((1, c, hw), lambda b: (b, 0, 0)),
        ),
        compiler_params=pltpu.CompilerParams(
            dimension_semantics=("parallel",)),
    )(x_flat, params["wb1_tap"], params["wb2_tap"], params["wh1_tap"],
      params["wh2_tap"], params["wm_col"], params["wa1_mat"], params["wa2_mat"])
    return out.reshape(n, c, h, w)


def _reference(x, params):
    """Pure-JAX reference of the PyTorch RCBup_L forward (f32, highest precision)."""
    P = jax.lax.Precision.HIGHEST

    def conv(xx, wt, groups=1, padding=1):
        return jax.lax.conv_general_dilated(
            xx, wt, window_strides=(1, 1),
            padding=((padding, padding), (padding, padding)),
            dimension_numbers=("NCHW", "OIHW", "NCHW"),
            feature_group_count=groups, precision=P)

    def leaky(v):
        return jnp.where(v >= 0, v, 0.2 * v)

    g = params["groups"]
    b = leaky(conv(x, params["wb1"], g))
    b = leaky(conv(b, params["wb2"], g))

    hh = leaky(conv(b, params["wh1"], 2))
    hh = conv(hh, params["wh2"], 2)

    n, c, hgt, wdt = hh.shape
    scores = conv(hh, params["wm"], padding=0).reshape(n, hgt * wdt)
    probs = jax.nn.softmax(scores, axis=-1)
    ctx = jnp.einsum("ncp,np->nc", hh.reshape(n, c, hgt * wdt), probs,
                     precision=P).reshape(n, c, 1, 1)

    t = leaky(conv(ctx, params["wa1"], padding=0))
    add = conv(t, params["wa2"], padding=0)

    gc = b + leaky(hh + add)          # ContextBlock output
    return x + leaky(gc)              # RCBup_L residual


if __name__ == "__main__":
    # RCBup_L(n_feat=4) on a (2, 4, 16, 16) input.
    n_feat = 4
    x = jax.random.normal(jax.random.PRNGKey(0), (2, n_feat, 16, 16),
                          dtype=jnp.float32)
    params = make_rcbup_params(n_feat, seed=0)

    out = rcbup_forward(x, params)
    out = jax.block_until_ready(out)

    ref = _reference(x, params)
    assert out.shape == x.shape, out.shape
    # Tolerance covers possible default-precision differences between the XLA
    # convolution path (reference) and the in-kernel MXU matmul path.
    np.testing.assert_allclose(np.asarray(out), np.asarray(ref),
                               rtol=2e-3, atol=2e-3)

    print("KERNEL_OK")
</pallas_src>

<mosaic_0001>
module attributes {stable_mosaic.version = 11 : i64} {
  func.func @_rcbup_kernel(%arg0: i32, %arg1: memref<1x4x256xf32, #tpu.memory_space<vmem>>, %arg2: memref<4x36xf32, #tpu.memory_space<vmem>>, %arg3: memref<4x36xf32, #tpu.memory_space<vmem>>, %arg4: memref<4x36xf32, #tpu.memory_space<vmem>>, %arg5: memref<4x36xf32, #tpu.memory_space<vmem>>, %arg6: memref<4x1xf32, #tpu.memory_space<vmem>>, %arg7: memref<4x4xf32, #tpu.memory_space<vmem>>, %arg8: memref<4x4xf32, #tpu.memory_space<vmem>>, %arg9: memref<1x4x256xf32, #tpu.memory_space<vmem>>) attributes {dimension_semantics = [#tpu.dimension_semantics<parallel>], iteration_bounds = array<i64: 2>, scalar_prefetch = 0 : i64, scratch_operands = 0 : i64, tpu.core_type = #tpu.core_type<tc>, window_params = [{transform_indices = @transform_0, window_bounds = array<i64: 1, 4, 256>}, {pipeline_mode = #tpu.pipeline_mode<synchronous>, transform_indices = @transform_1, window_bounds = array<i64: 4, 36>}, {pipeline_mode = #tpu.pipeline_mode<synchronous>, transform_indices = @transform_2, window_bounds = array<i64: 4, 36>}, {pipeline_mode = #tpu.pipeline_mode<synchronous>, transform_indices = @transform_3, window_bounds = array<i64: 4, 36>}, {pipeline_mode = #tpu.pipeline_mode<synchronous>, transform_indices = @transform_4, window_bounds = array<i64: 4, 36>}, {pipeline_mode = #tpu.pipeline_mode<synchronous>, transform_indices = @transform_5, window_bounds = array<i64: 4, 1>}, {pipeline_mode = #tpu.pipeline_mode<synchronous>, transform_indices = @transform_6, window_bounds = array<i64: 4, 4>}, {pipeline_mode = #tpu.pipeline_mode<synchronous>, transform_indices = @transform_7, window_bounds = array<i64: 4, 4>}, {transform_indices = @transform_8, window_bounds = array<i64: 1, 4, 256>}]} {
    %c0 = arith.constant 0 : index
    %c0_0 = arith.constant 0 : index
    %c0_1 = arith.constant 0 : index
    %0 = vector.load %arg1[%c0, %c0_0, %c0_1] : memref<1x4x256xf32, #tpu.memory_space<vmem>>, vector<1x4x256xf32>
    %1 = vector.shape_cast %0 : vector<1x4x256xf32> to vector<4x256xf32>
    %2 = tpu.iota {dimensions = array<i32: 1>} : vector<1x256xi32>
    %c16_i32 = arith.constant 16 : i32
    %c0_i32 = arith.constant 0 : i32
    %3 = arith.cmpi eq, %c16_i32, %c0_i32 : i32
    %c1_i32 = arith.constant 1 : i32
    %4 = arith.select %3, %c1_i32, %c16_i32 : i32
    %5 = vector.broadcast %4 : i32 to vector<1x256xi32>
    %6 = arith.remsi %2, %5 : vector<1x256xi32>
    %c0_i32_2 = arith.constant 0 : i32
    %7 = vector.broadcast %c0_i32_2 : i32 to vector<1x256xi32>
    %8 = arith.cmpi ne, %6, %7 : vector<1x256xi32>
    %c0_i32_3 = arith.constant 0 : i32
    %9 = vector.broadcast %c0_i32_3 : i32 to vector<1x256xi32>
    %10 = arith.cmpi slt, %6, %9 : vector<1x256xi32>
    %c0_i32_4 = arith.constant 0 : i32
    %11 = arith.cmpi slt, %4, %c0_i32_4 : i32
    %12 = vector.broadcast %11 : i1 to vector<1x256xi1>
    %13 = vector.broadcast %12 : vector<1x256xi1> to vector<1x256xi1>
    %14 = arith.xori %10, %13 : vector<1x256xi1>
    %15 = arith.andi %14, %8 : vector<1x256xi1>
    %16 = vector.broadcast %4 : i32 to vector<1x256xi32>
    %17 = arith.addi %6, %16 : vector<1x256xi32>
    %18 = arith.select %15, %17, %6 : vector<1x256xi1>, vector<1x256xi32>
    %c0_i32_5 = arith.constant 0 : i32
    %19 = vector.broadcast %c0_i32_5 : i32 to vector<1x256xi32>
    %20 = arith.cmpi sgt, %18, %19 : vector<1x256xi32>
    %21 = arith.extui %20 : vector<1x256xi1> to vector<1x256xi32>
    %22 = arith.sitofp %21 : vector<1x256xi32> to vector<1x256xf32>
    %c15_i32 = arith.constant 15 : i32
    %23 = vector.broadcast %c15_i32 : i32 to vector<1x256xi32>
    %24 = arith.cmpi slt, %18, %23 : vector<1x256xi32>
    %25 = arith.extui %24 : vector<1x256xi1> to vector<1x256xi32>
    %26 = arith.sitofp %25 : vector<1x256xi32> to vector<1x256xf32>
    %cst = arith.constant 0.000000e+00 : f32
    %27 = vector.broadcast %cst : f32 to vector<4x17xf32>
    %c0_6 = arith.constant 0 : index
    %c0_7 = arith.constant 0 : index
    %28 = vector.load %arg2[%c0_6, %c0_7] : memref<4x36xf32, #tpu.memory_space<vmem>>, vector<4x36xf32>
    %29 = tpu.concatenate %27, %1, %27 in 1 : vector<4x17xf32>, vector<4x256xf32>, vector<4x17xf32> -> vector<4x290xf32>
    %30 = vector.extract_strided_slice %29 {offsets = [0, 0], sizes = [4, 256], strides = [1, 1]} : vector<4x290xf32> to vector<4x256xf32>
    %31 = vector.broadcast %22 : vector<1x256xf32> to vector<4x256xf32>
    %32 = arith.mulf %30, %31 : vector<4x256xf32>
    %33 = vector.extract_strided_slice %29 {offsets = [0, 1], sizes = [4, 256], strides = [1, 1]} : vector<4x290xf32> to vector<4x256xf32>
    %34 = vector.extract_strided_slice %29 {offsets = [0, 2], sizes = [4, 256], strides = [1, 1]} : vector<4x290xf32> to vector<4x256xf32>
    %35 = vector.broadcast %26 : vector<1x256xf32> to vector<4x256xf32>
    %36 = arith.mulf %34, %35 : vector<4x256xf32>
    %37 = vector.extract_strided_slice %29 {offsets = [0, 16], sizes = [4, 256], strides = [1, 1]} : vector<4x290xf32> to vector<4x256xf32>
    %38 = vector.broadcast %22 : vector<1x256xf32> to vector<4x256xf32>
    %39 = arith.mulf %37, %38 : vector<4x256xf32>
    %40 = vector.extract_strided_slice %29 {offsets = [0, 17], sizes = [4, 256], strides = [1, 1]} : vector<4x290xf32> to vector<4x256xf32>
    %41 = vector.extract_strided_slice %29 {offsets = [0, 18], sizes = [4, 256], strides = [1, 1]} : vector<4x290xf32> to vector<4x256xf32>
    %42 = vector.broadcast %26 : vector<1x256xf32> to vector<4x256xf32>
    %43 = arith.mulf %41, %42 : vector<4x256xf32>
    %44 = vector.extract_strided_slice %29 {offsets = [0, 32], sizes = [4, 256], strides = [1, 1]} : vector<4x290xf32> to vector<4x256xf32>
    %45 = vector.broadcast %22 : vector<1x256xf32> to vector<4x256xf32>
    %46 = arith.mulf %44, %45 : vector<4x256xf32>
    %47 = vector.extract_strided_slice %29 {offsets = [0, 33], sizes = [4, 256], strides = [1, 1]} : vector<4x290xf32> to vector<4x256xf32>
    %48 = vector.extract_strided_slice %29 {offsets = [0, 34], sizes = [4, 256], strides = [1, 1]} : vector<4x290xf32> to vector<4x256xf32>
    %49 = vector.broadcast %26 : vector<1x256xf32> to vector<4x256xf32>
    %50 = arith.mulf %48, %49 : vector<4x256xf32>
    %51 = tpu.concatenate %32, %33, %36, %39, %40, %43, %46, %47, %50 in 0 : vector<4x256xf32>, vector<4x256xf32>, vector<4x256xf32>, vector<4x256xf32>, vector<4x256xf32>, vector<4x256xf32>, vector<4x256xf32>, vector<4x256xf32>, vector<4x256xf32> -> vector<36x256xf32>
    %cst_8 = arith.constant dense<0.000000e+00> : vector<4x256xf32>
    %52 = tpu.matmul %28, %51, %cst_8 {dimension_numbers = #tpu.dot_dimension_numbers<[1], [0], [0], [1], [0, 0, 1, 1], [], []>} : vector<4x36xf32>, vector<36x256xf32>, vector<4x256xf32> -> vector<4x256xf32>
    %cst_9 = arith.constant 2.000000e-01 : f32
    %53 = vector.broadcast %cst_9 : f32 to vector<4x256xf32>
    %54 = arith.mulf %53, %52 : vector<4x256xf32>
    %55 = arith.maximumf %52, %54 : vector<4x256xf32>
    %c0_10 = arith.constant 0 : index
    %c0_11 = arith.constant 0 : index
    %56 = vector.load %arg3[%c0_10, %c0_11] : memref<4x36xf32, #tpu.memory_space<vmem>>, vector<4x36xf32>
    %57 = tpu.concatenate %27, %55, %27 in 1 : vector<4x17xf32>, vector<4x256xf32>, vector<4x17xf32> -> vector<4x290xf32>
    %58 = vector.extract_strided_slice %57 {offsets = [0, 0], sizes = [4, 256], strides = [1, 1]} : vector<4x290xf32> to vector<4x256xf32>
    %59 = vector.broadcast %22 : vector<1x256xf32> to vector<4x256xf32>
    %60 = arith.mulf %58, %59 : vector<4x256xf32>
    %61 = vector.extract_strided_slice %57 {offsets = [0, 1], sizes = [4, 256], strides = [1, 1]} : vector<4x290xf32> to vector<4x256xf32>
    %62 = vector.extract_strided_slice %57 {offsets = [0, 2], sizes = [4, 256], strides = [1, 1]} : vector<4x290xf32> to vector<4x256xf32>
    %63 = vector.broadcast %26 : vector<1x256xf32> to vector<4x256xf32>
    %64 = arith.mulf %62, %63 : vector<4x256xf32>
    %65 = vector.extract_strided_slice %57 {offsets = [0, 16], sizes = [4, 256], strides = [1, 1]} : vector<4x290xf32> to vector<4x256xf32>
    %66 = vector.broadcast %22 : vector<1x256xf32> to vector<4x256xf32>
    %67 = arith.mulf %65, %66 : vector<4x256xf32>
    %68 = vector.extract_strided_slice %57 {offsets = [0, 17], sizes = [4, 256], strides = [1, 1]} : vector<4x290xf32> to vector<4x256xf32>
    %69 = vector.extract_strided_slice %57 {offsets = [0, 18], sizes = [4, 256], strides = [1, 1]} : vector<4x290xf32> to vector<4x256xf32>
    %70 = vector.broadcast %26 : vector<1x256xf32> to vector<4x256xf32>
    %71 = arith.mulf %69, %70 : vector<4x256xf32>
    %72 = vector.extract_strided_slice %57 {offsets = [0, 32], sizes = [4, 256], strides = [1, 1]} : vector<4x290xf32> to vector<4x256xf32>
    %73 = vector.broadcast %22 : vector<1x256xf32> to vector<4x256xf32>
    %74 = arith.mulf %72, %73 : vector<4x256xf32>
    %75 = vector.extract_strided_slice %57 {offsets = [0, 33], sizes = [4, 256], strides = [1, 1]} : vector<4x290xf32> to vector<4x256xf32>
    %76 = vector.extract_strided_slice %57 {offsets = [0, 34], sizes = [4, 256], strides = [1, 1]} : vector<4x290xf32> to vector<4x256xf32>
    %77 = vector.broadcast %26 : vector<1x256xf32> to vector<4x256xf32>
    %78 = arith.mulf %76, %77 : vector<4x256xf32>
    %79 = tpu.concatenate %60, %61, %64, %67, %68, %71, %74, %75, %78 in 0 : vector<4x256xf32>, vector<4x256xf32>, vector<4x256xf32>, vector<4x256xf32>, vector<4x256xf32>, vector<4x256xf32>, vector<4x256xf32>, vector<4x256xf32>, vector<4x256xf32> -> vector<36x256xf32>
    %cst_12 = arith.constant dense<0.000000e+00> : vector<4x256xf32>
    %80 = tpu.matmul %56, %79, %cst_12 {dimension_numbers = #tpu.dot_dimension_numbers<[1], [0], [0], [1], [0, 0, 1, 1], [], []>} : vector<4x36xf32>, vector<36x256xf32>, vector<4x256xf32> -> vector<4x256xf32>
    %cst_13 = arith.constant 2.000000e-01 : f32
    %81 = vector.broadcast %cst_13 : f32 to vector<4x256xf32>
    %82 = arith.mulf %81, %80 : vector<4x256xf32>
    %83 = arith.maximumf %80, %82 : vector<4x256xf32>
    %c0_14 = arith.constant 0 : index
    %c0_15 = arith.constant 0 : index
    %84 = vector.load %arg4[%c0_14, %c0_15] : memref<4x36xf32, #tpu.memory_space<vmem>>, vector<4x36xf32>
    %85 = tpu.concatenate %27, %83, %27 in 1 : vector<4x17xf32>, vector<4x256xf32>, vector<4x17xf32> -> vector<4x290xf32>
    %86 = vector.extract_strided_slice %85 {offsets = [0, 0], sizes = [4, 256], strides = [1, 1]} : vector<4x290xf32> to vector<4x256xf32>
    %87 = vector.broadcast %22 : vector<1x256xf32> to vector<4x256xf32>
    %88 = arith.mulf %86, %87 : vector<4x256xf32>
    %89 = vector.extract_strided_slice %85 {offsets = [0, 1], sizes = [4, 256], strides = [1, 1]} : vector<4x290xf32> to vector<4x256xf32>
    %90 = vector.extract_strided_slice %85 {offsets = [0, 2], sizes = [4, 256], strides = [1, 1]} : vector<4x290xf32> to vector<4x256xf32>
    %91 = vector.broadcast %26 : vector<1x256xf32> to vector<4x256xf32>
    %92 = arith.mulf %90, %91 : vector<4x256xf32>
    %93 = vector.extract_strided_slice %85 {offsets = [0, 16], sizes = [4, 256], strides = [1, 1]} : vector<4x290xf32> to vector<4x256xf32>
    %94 = vector.broadcast %22 : vector<1x256xf32> to vector<4x256xf32>
    %95 = arith.mulf %93, %94 : vector<4x256xf32>
    %96 = vector.extract_strided_slice %85 {offsets = [0, 17], sizes = [4, 256], strides = [1, 1]} : vector<4x290xf32> to vector<4x256xf32>
    %97 = vector.extract_strided_slice %85 {offsets = [0, 18], sizes = [4, 256], strides = [1, 1]} : vector<4x290xf32> to vector<4x256xf32>
    %98 = vector.broadcast %26 : vector<1x256xf32> to vector<4x256xf32>
    %99 = arith.mulf %97, %98 : vector<4x256xf32>
    %100 = vector.extract_strided_slice %85 {offsets = [0, 32], sizes = [4, 256], strides = [1, 1]} : vector<4x290xf32> to vector<4x256xf32>
    %101 = vector.broadcast %22 : vector<1x256xf32> to vector<4x256xf32>
    %102 = arith.mulf %100, %101 : vector<4x256xf32>
    %103 = vector.extract_strided_slice %85 {offsets = [0, 33], sizes = [4, 256], strides = [1, 1]} : vector<4x290xf32> to vector<4x256xf32>
    %104 = vector.extract_strided_slice %85 {offsets = [0, 34], sizes = [4, 256], strides = [1, 1]} : vector<4x290xf32> to vector<4x256xf32>
    %105 = vector.broadcast %26 : vector<1x256xf32> to vector<4x256xf32>
    %106 = arith.mulf %104, %105 : vector<4x256xf32>
    %107 = tpu.concatenate %88, %89, %92, %95, %96, %99, %102, %103, %106 in 0 : vector<4x256xf32>, vector<4x256xf32>, vector<4x256xf32>, vector<4x256xf32>, vector<4x256xf32>, vector<4x256xf32>, vector<4x256xf32>, vector<4x256xf32>, vector<4x256xf32> -> vector<36x256xf32>
    %cst_16 = arith.constant dense<0.000000e+00> : vector<4x256xf32>
    %108 = tpu.matmul %84, %107, %cst_16 {dimension_numbers = #tpu.dot_dimension_numbers<[1], [0], [0], [1], [0, 0, 1, 1], [], []>} : vector<4x36xf32>, vector<36x256xf32>, vector<4x256xf32> -> vector<4x256xf32>
    %cst_17 = arith.constant 2.000000e-01 : f32
    %109 = vector.broadcast %cst_17 : f32 to vector<4x256xf32>
    %110 = arith.mulf %109, %108 : vector<4x256xf32>
    %111 = arith.maximumf %108, %110 : vector<4x256xf32>
    %c0_18 = arith.constant 0 : index
    %c0_19 = arith.constant 0 : index
    %112 = vector.load %arg5[%c0_18, %c0_19] : memref<4x36xf32, #tpu.memory_space<vmem>>, vector<4x36xf32>
    %113 = tpu.concatenate %27, %111, %27 in 1 : vector<4x17xf32>, vector<4x256xf32>, vector<4x17xf32> -> vector<4x290xf32>
    %114 = vector.extract_strided_slice %113 {offsets = [0, 0], sizes = [4, 256], strides = [1, 1]} : vector<4x290xf32> to vector<4x256xf32>
    %115 = vector.broadcast %22 : vector<1x256xf32> to vector<4x256xf32>
    %116 = arith.mulf %114, %115 : vector<4x256xf32>
    %117 = vector.extract_strided_slice %113 {offsets = [0, 1], sizes = [4, 256], strides = [1, 1]} : vector<4x290xf32> to vector<4x256xf32>
    %118 = vector.extract_strided_slice %113 {offsets = [0, 2], sizes = [4, 256], strides = [1, 1]} : vector<4x290xf32> to vector<4x256xf32>
    %119 = vector.broadcast %26 : vector<1x256xf32> to vector<4x256xf32>
    %120 = arith.mulf %118, %119 : vector<4x256xf32>
    %121 = vector.extract_strided_slice %113 {offsets = [0, 16], sizes = [4, 256], strides = [1, 1]} : vector<4x290xf32> to vector<4x256xf32>
    %122 = vector.broadcast %22 : vector<1x256xf32> to vector<4x256xf32>
    %123 = arith.mulf %121, %122 : vector<4x256xf32>
    %124 = vector.extract_strided_slice %113 {offsets = [0, 17], sizes = [4, 256], strides = [1, 1]} : vector<4x290xf32> to vector<4x256xf32>
    %125 = vector.extract_strided_slice %113 {offsets = [0, 18], sizes = [4, 256], strides = [1, 1]} : vector<4x290xf32> to vector<4x256xf32>
    %126 = vector.broadcast %26 : vector<1x256xf32> to vector<4x256xf32>
    %127 = arith.mulf %125, %126 : vector<4x256xf32>
    %128 = vector.extract_strided_slice %113 {offsets = [0, 32], sizes = [4, 256], strides = [1, 1]} : vector<4x290xf32> to vector<4x256xf32>
    %129 = vector.broadcast %22 : vector<1x256xf32> to vector<4x256xf32>
    %130 = arith.mulf %128, %129 : vector<4x256xf32>
    %131 = vector.extract_strided_slice %113 {offsets = [0, 33], sizes = [4, 256], strides = [1, 1]} : vector<4x290xf32> to vector<4x256xf32>
    %132 = vector.extract_strided_slice %113 {offsets = [0, 34], sizes = [4, 256], strides = [1, 1]} : vector<4x290xf32> to vector<4x256xf32>
    %133 = vector.broadcast %26 : vector<1x256xf32> to vector<4x256xf32>
    %134 = arith.mulf %132, %133 : vector<4x256xf32>
    %135 = tpu.concatenate %116, %117, %120, %123, %124, %127, %130, %131, %134 in 0 : vector<4x256xf32>, vector<4x256xf32>, vector<4x256xf32>, vector<4x256xf32>, vector<4x256xf32>, vector<4x256xf32>, vector<4x256xf32>, vector<4x256xf32>, vector<4x256xf32> -> vector<36x256xf32>
    %cst_20 = arith.constant dense<0.000000e+00> : vector<4x256xf32>
    %136 = tpu.matmul %112, %135, %cst_20 {dimension_numbers = #tpu.dot_dimension_numbers<[1], [0], [0], [1], [0, 0, 1, 1], [], []>} : vector<4x36xf32>, vector<36x256xf32>, vector<4x256xf32> -> vector<4x256xf32>
    %c0_21 = arith.constant 0 : index
    %c0_22 = arith.constant 0 : index
    %137 = vector.load %arg6[%c0_21, %c0_22] : memref<4x1xf32, #tpu.memory_space<vmem>>, vector<4x1xf32>
    %138 = vector.broadcast %137 : vector<4x1xf32> to vector<4x256xf32>
    %139 = arith.mulf %136, %138 : vector<4x256xf32>
    %cst_23 = arith.constant dense<0.000000e+00> : vector<256xf32>
    %140 = vector.multi_reduction <add>, %139, %cst_23 [0] : vector<4x256xf32> to vector<256xf32>
    %141 = vector.shape_cast %140 : vector<256xf32> to vector<1x256xf32>
    %cst_24 = arith.constant dense<0xFF800000> : vector<1xf32>
    %142 = vector.multi_reduction <maximumf>, %141, %cst_24 [1] : vector<1x256xf32> to vector<1xf32>
    %143 = vector.shape_cast %142 : vector<1xf32> to vector<1x1xf32>
    %144 = vector.broadcast %143 : vector<1x1xf32> to vector<1x256xf32>
    %145 = arith.subf %141, %144 : vector<1x256xf32>
    %146 = math.exp %145 : vector<1x256xf32>
    %cst_25 = arith.constant dense<0.000000e+00> : vector<1xf32>
    %147 = vector.multi_reduction <add>, %146, %cst_25 [1] : vector<1x256xf32> to vector<1xf32>
    %148 = vector.shape_cast %147 : vector<1xf32> to vector<1x1xf32>
    %149 = vector.broadcast %148 : vector<1x1xf32> to vector<1x256xf32>
    %150 = arith.divf %146, %149 : vector<1x256xf32>
    %151 = vector.broadcast %150 : vector<1x256xf32> to vector<4x256xf32>
    %152 = arith.mulf %136, %151 : vector<4x256xf32>
    %cst_26 = arith.constant dense<0.000000e+00> : vector<4xf32>
    %153 = vector.multi_reduction <add>, %152, %cst_26 [1] : vector<4x256xf32> to vector<4xf32>
    %154 = vector.shape_cast %153 : vector<4xf32> to vector<4x1xf32>
    %c0_27 = arith.constant 0 : index
    %c0_28 = arith.constant 0 : index
    %155 = vector.load %arg7[%c0_27, %c0_28] : memref<4x4xf32, #tpu.memory_space<vmem>>, vector<4x4xf32>
    %cst_29 = arith.constant dense<0.000000e+00> : vector<4x1xf32>
    %156 = tpu.matmul %155, %154, %cst_29 {dimension_numbers = #tpu.dot_dimension_numbers<[1], [0], [0], [1], [0, 0, 1, 1], [], []>} : vector<4x4xf32>, vector<4x1xf32>, vector<4x1xf32> -> vector<4x1xf32>
    %cst_30 = arith.constant 2.000000e-01 : f32
    %157 = vector.broadcast %cst_30 : f32 to vector<4x1xf32>
    %158 = arith.mulf %157, %156 : vector<4x1xf32>
    %159 = arith.maximumf %156, %158 : vector<4x1xf32>
    %c0_31 = arith.constant 0 : index
    %c0_32 = arith.constant 0 : index
    %160 = vector.load %arg8[%c0_31, %c0_32] : memref<4x4xf32, #tpu.memory_space<vmem>>, vector<4x4xf32>
    %cst_33 = arith.constant dense<0.000000e+00> : vector<4x1xf32>
    %161 = tpu.matmul %160, %159, %cst_33 {dimension_numbers = #tpu.dot_dimension_numbers<[1], [0], [0], [1], [0, 0, 1, 1], [], []>} : vector<4x4xf32>, vector<4x1xf32>, vector<4x1xf32> -> vector<4x1xf32>
    %162 = vector.broadcast %161 : vector<4x1xf32> to vector<4x256xf32>
    %163 = arith.addf %136, %162 : vector<4x256xf32>
    %cst_34 = arith.constant 2.000000e-01 : f32
    %164 = vector.broadcast %cst_34 : f32 to vector<4x256xf32>
    %165 = arith.mulf %164, %163 : vector<4x256xf32>
    %166 = arith.maximumf %163, %165 : vector<4x256xf32>
    %167 = arith.addf %83, %166 : vector<4x256xf32>
    %cst_35 = arith.constant 2.000000e-01 : f32
    %168 = vector.broadcast %cst_35 : f32 to vector<4x256xf32>
    %169 = arith.mulf %168, %167 : vector<4x256xf32>
    %170 = arith.maximumf %167, %169 : vector<4x256xf32>
    %171 = arith.addf %1, %170 : vector<4x256xf32>
    %c0_36 = arith.constant 0 : index
    %c0_37 = arith.constant 0 : index
    %c0_38 = arith.constant 0 : index
    %172 = vector.load %arg9[%c0_36, %c0_37, %c0_38] : memref<1x4x256xf32, #tpu.memory_space<vmem>>, vector<1x4x256xf32>
    %173 = vector.shape_cast %172 : vector<1x4x256xf32> to vector<4x256xf32>
    %174 = vector.shape_cast %171 : vector<4x256xf32> to vector<1x4x256xf32>
    tpu.vector_store %arg9[%c0_36, %c0_37, %c0_38], %174 {strides = array<i32>} : memref<1x4x256xf32, #tpu.memory_space<vmem>>, vector<1x4x256xf32>,
    return
  }
  func.func @transform_0(%arg0: i32) -> (i32, i32, i32) {
    %c0_i32 = arith.constant 0 : i32
    %c0_i32_0 = arith.constant 0 : i32
    %c0_i32_1 = arith.constant 0 : i32
    return %arg0, %c0_i32, %c0_i32_0 : i32, i32, i32
  }
  func.func @transform_1(%arg0: i32) -> (i32, i32) {
    %c0_i32 = arith.constant 0 : i32
    %c0_i32_0 = arith.constant 0 : i32
    %c0_i32_1 = arith.constant 0 : i32
    return %c0_i32, %c0_i32_0 : i32, i32
  }
  func.func @transform_2(%arg0: i32) -> (i32, i32) {
    %c0_i32 = arith.constant 0 : i32
    %c0_i32_0 = arith.constant 0 : i32
    %c0_i32_1 = arith.constant 0 : i32
    return %c0_i32, %c0_i32_0 : i32, i32
  }
  func.func @transform_3(%arg0: i32) -> (i32, i32) {
    %c0_i32 = arith.constant 0 : i32
    %c0_i32_0 = arith.constant 0 : i32
    %c0_i32_1 = arith.constant 0 : i32
    return %c0_i32, %c0_i32_0 : i32, i32
  }
  func.func @transform_4(%arg0: i32) -> (i32, i32) {
    %c0_i32 = arith.constant 0 : i32
    %c0_i32_0 = arith.constant 0 : i32
    %c0_i32_1 = arith.constant 0 : i32
    return %c0_i32, %c0_i32_0 : i32, i32
  }
  func.func @transform_5(%arg0: i32) -> (i32, i32) {
    %c0_i32 = arith.constant 0 : i32
    %c0_i32_0 = arith.constant 0 : i32
    %c0_i32_1 = arith.constant 0 : i32
    return %c0_i32, %c0_i32_0 : i32, i32
  }
  func.func @transform_6(%arg0: i32) -> (i32, i32) {
    %c0_i32 = arith.constant 0 : i32
    %c0_i32_0 = arith.constant 0 : i32
    %c0_i32_1 = arith.constant 0 : i32
    return %c0_i32, %c0_i32_0 : i32, i32
  }
  func.func @transform_7(%arg0: i32) -> (i32, i32) {
    %c0_i32 = arith.constant 0 : i32
    %c0_i32_0 = arith.constant 0 : i32
    %c0_i32_1 = arith.constant 0 : i32
    return %c0_i32, %c0_i32_0 : i32, i32
  }
  func.func @transform_8(%arg0: i32) -> (i32, i32, i32) {
    %c0_i32 = arith.constant 0 : i32
    %c0_i32_0 = arith.constant 0 : i32
    %c0_i32_1 = arith.constant 0 : i32
    return %arg0, %c0_i32, %c0_i32_0 : i32, i32, i32
  }
}

</mosaic_0001>

<bundles_post_ra>
// kernel: tpu_custom_call.1
= control target key start
LH: loop header
LB: loop body
LE: loop exit
PB: predicated region body
PF: predicated region fallthrough
CT: control target
= control target key end

     0   :  { %s2692_s0 = inlined_call_operand.hbm [shape: f32[2,4,256], index: 0, kind: input, shape index: {}]   ;;  %s2693_s1 = inlined_call_operand.vmem [shape: f32[4,36], index: 1, kind: input, shape index: {}]   ;;  %s2694_s2 = inlined_call_operand.vmem [shape: f32[4,36], index: 2, kind: input, shape index: {}]   ;;  %s2695_s3 = inlined_call_operand.hbm [shape: f32[4,36], index: 3, kind: input, shape index: {}]   ;;  %s2696_s4 = inlined_call_operand.vmem [shape: f32[4,36], index: 4, kind: input, shape index: {}]   ;;  %s2697_s5 = inlined_call_operand.vmem [shape: f32[4,1], index: 5, kind: input, shape index: {}]   ;;  %s2698_s6 = inlined_call_operand.hbm [shape: f32[4,4], index: 6, kind: input, shape index: {}]   ;;  %s2699_s7 = inlined_call_operand.vmem [shape: f32[4,4], index: 7, kind: input, shape index: {}]   ;;  %s2700_s8 = inlined_call_operand.hbm [shape: f32[2,4,256], index: 8, kind: output, shape index: {}]  }
   0x1   :  { %2705 = sst [smem:[#allocation13_spill]] %s2695_s3 }
   0x2   :  { %2706 = sst [smem:[#allocation14_spill]] %s2698_s6 }
   0x3   :  { %13 = vsyncpa [#allocation3], 0 }
   0x4   :  { %15 = vsyncpa [#allocation3 + $0x1], 0 }
   0x5   :  { %16 = vsyncpa [#allocation6], 0 }
   0x6   :  { %17 = vsyncpa [#allocation4], 0 }
   0x7   :  { %19 = vsyncpa [#allocation4 + $0x1], 0  ;;  %s2056_s27 = smov 0   ;;  %s2058_s28 = smov 0  }
   0x8   :  { %s2060_s29 = smov 0   ;;  %s2062_s30 = smov 0  }
   0x9 LB: > { %s2077_s9 = sadd.s32 4294967295, %s1988_s30   ;;  %s1667_s10 = sadd.s32 4294967294, %s1988_s30   ;;  %s1988_s30 = sphi %s2062_s30, %s2728_s30   ;;  %s1984_s29 = sphi %s2060_s29, %s2727_s29   ;;  %s1980_s28 = sphi %s2058_s28, %s2726_s28   ;;  %s1976_s27 = sphi %s2056_s27, %s2725_s27  }
   0xa   : > { %p45_p0 = scmp.ne.s32.totalorder %s1980_s28, %s1976_s27  ;;  %p2701_p1 = scmp.eq.s32.totalorder %s2077_s9, 0 }
   0xb   : > { %p222_p3 = scmp.eq.s32.totalorder %s1667_s10, 1  ;;  %p1668_p5 = scmp.ge.s32.totalorder %s1988_s30, 1 }
   0xc   : > { %p2086_p4 = por %p2701_p1, %p45_p0  ;;  %p229_p7 = scmp.lt.s32.totalorder %s1988_s30, 3 }
   0xd   : > { %p2091_p6 = por %p222_p3, %p45_p0  ;;  %s1990_s14 = smov [#allocation5]  }
   0xe   : > { %s2707_s11 = scalar_select %p2086_p4, 1, 0 }
   0xf   : > { %s2708_s12 = scalar_select %p2091_p6, 1, 0 }
  0x10   : > { %p2096_p8 = pnand %p1668_p5, %p229_p7  ;;  %s248_s15 = sshll.u32 %s1990_s14, 4  ;;  %s249_s15 = int_to_ptr.vmem [resolvable:$true] %s248_s15 }
  0x11   : > { %s1991_s16 = smov [#allocation7]   ;;  %s2110_s19 = sadd.s32 1, %s1988_s30  }
  0x12   : > { %s2709_s13 = scalar_select %p2096_p8, 1, 0 }
  0x13   : > { %p1733_p10 = pneg %p2096_p8  ;;  %s265_s17 = sshll.u32 %s1991_s16, 4  ;;  %s266_s17 = int_to_ptr.vmem [resolvable:$true] %s265_s17 }
  0x14   : > { %s29_s20 = ssub.s32 %s1988_s30, %s2110_s19  ;;  %s1851_s21 = scalar_lea.vmem %s249_s15, 64 }
  0x15   : > { %p2105_p11 = pnand %p1733_p10, %p2701_p1  ;;  %p1852_p13 = scmp.ne.s32.totalorder %s249_s15, %s1851_s21 }
  0x16   : > { %p1859_p5 = scmp.lt.s32.totalorder %s249_s15, %s249_s15  ;;  %p1860_p7 = scmp.lt.s32.totalorder %s1851_s21, %s1851_s21 }
  0x17   : > { %p1842_p12 = pneg %p2105_p11 }
  0x18   : > { %p1861_p10 = por %p1860_p7, %p1859_p5 }
  0x19   : > { %p1854_p0 = pnand %p1852_p13, %p1842_p12 }
  0x1b   : > { %p1855_p3 = pneg %p1854_p0 }
  0x1d   : > { %p1862_p9 = pnand %p1861_p10, %p1855_p3 }
  0x1f   : > { %1865 = shalt.err (!%p1862_p9)
}
  0x20   : > { %s2711_s3 = sld [smem:[#allocation13_spill]]  ;;  %s1877_s24 = scalar_lea.vmem %s266_s17, 64 }
  0x21   : > { %p1878_p1 = scmp.ne.s32.totalorder %s266_s17, %s1877_s24  ;;  %p1885_p13 = scmp.lt.s32.totalorder %s266_s17, %s266_s17 }
  0x22   : > { %p1886_p0 = scmp.lt.s32.totalorder %s1877_s24, %s1877_s24 }
  0x23   : > { %p1880_p2 = pnand %p1878_p1, %p1842_p12 }
  0x24   : > { %p1887_p4 = por %p1886_p0, %p1885_p13 }
  0x25   : > { %p1881_p6 = pneg %p1880_p2 }
  0x26   : > { %1736 = dma.hbm_to_vmem [thread:$0]  (!%p2105_p11), %s2711_s3, 64, %s249_s15, [#allocation6]  }
  0x27   : > { %p1888_p8 = pnand %p1887_p4, %p1881_p6 }
  0x29   : > { %1891 = shalt.err (!%p1888_p8)
}
  0x2a   : > { %s2712_s6 = sld [smem:[#allocation14_spill]]  ;;  %p30_p1 = scmp.eq.s32.totalorder %s29_s20, 0 }
  0x2b   : > { %s32_s10 = sadd.s32 1, %s1984_s29  ;;  %p39_p2 = scmp.ne.s32.totalorder %s1984_s29, %s1980_s28 }
  0x2c   : > { %p40_p4 = scmp.eq.s32.totalorder %s1988_s30, 0  ;;  %p2714_p8 = scmp.eq.s32.totalorder %s2077_s9, 1 }
  0x2d   : > { %s2137_s14 = scalar_select %p30_p1, %s1984_s29, %s32_s10  }
  0x2e   : > { %p41_p6 = por %p40_p4, %p39_p2  ;;  %p2141_p9 = por %p2714_p8, %p39_p2 }
  0x2f   : > { %2713 = sst [smem:[#allocation12_spill]] %s2137_s14  ;;  %p1750_p12 = scmp.lt.s32.totalorder %s1988_s30, 2 }
  0x30   : > { %1739 = dma.hbm_to_vmem [thread:$0]  (!%p2105_p11), %s2712_s6, 64, %s266_s17, [#allocation6]  }
  0x31   : > { %s2715_s15 = scalar_select %p2141_p9, 1, 0 }
  0x32   : > { %s279_s16 = sand.u32 1, %s1984_s29   ;;  %s1705_s21 = sshll.u32 %s1988_s30, 7 }
  0x33   : > { %s1672_s18 = sshll.u32 %s279_s16, 3  ;;  %s2151_s17 = scalar_lea.hbm %s2692_s0, %s1705_s21 }
  0x34   : > { %s283_s20 = scalar_lea.vmem [#allocation2], %s1672_s18  ;;  %p2153_p11 = pnand %p1750_p12, %p41_p6 }
  0x35   : > { %s291_s24 = sshll.u32 %s283_s20, 4  ;;  %s280_s26 = scalar_lea.sflag [#allocation3], %s279_s16  ;;  %s292_s24 = int_to_ptr.vmem [resolvable:$true] %s291_s24 }
  0x36   : > { %s1892_s10 = scalar_lea.hbm %s2151_s17, 128  ;;  %p1894_p5 = pneg %p2153_p11 }
  0x37   : > { %p1893_p3 = scmp.ne.s32.totalorder %s2151_s17, %s1892_s10  ;;  %s1897_s23 = scalar_lea.hbm %s2692_s0, 256 }
  0x38   : > { %p1898_p13 = scmp.lt.s32.totalorder %s2151_s17, %s2692_s0  ;;  %p1899_p0 = scmp.lt.s32.totalorder %s1897_s23, %s1892_s10 }
  0x39   : > { %p1895_p7 = pnand %p1894_p5, %p1893_p3 }
  0x3a   : > { %p1900_p1 = por %p1899_p0, %p1898_p13 }
  0x3b   : > { %p1896_p10 = pneg %p1895_p7 }
  0x3d   : > { %p1901_p2 = pnand %p1900_p1, %p1896_p10 }
  0x3f   : > { %1904 = shalt.err (!%p1901_p2)
}
  0x40   : > { %s1905_s20 = scalar_lea.vmem %s292_s24, 128  ;;  %s1992_s16 = smov [#allocation2]  }
  0x41   : > { %p1906_p4 = scmp.ne.s32.totalorder %s292_s24, %s1905_s20  ;;  %s1910_s6 = sshll.u32 %s1992_s16, 4  ;;  %s1911_s6 = int_to_ptr.vmem [resolvable:$false] %s1910_s6 }
  0x42   : > { %s1912_s14 = scalar_lea.vmem %s1911_s6, 256  ;;  %p1913_p12 = scmp.lt.s32.totalorder %s292_s24, %s1911_s6 }
  0x43   : > { %p1908_p6 = pnand %p1906_p4, %p1894_p5  ;;  %p1914_p3 = scmp.lt.s32.totalorder %s1912_s14, %s1905_s20 }
  0x45   : > { %p1909_p8 = pneg %p1908_p6  ;;  %p1915_p7 = por %p1914_p3, %p1913_p12 }
  0x47   : > { %p1916_p9 = pnand %p1915_p7, %p1909_p8 }
  0x49   : > { %1919 = shalt.err (!%p1916_p9)
}
  0x4a   : > { %1743 = dma.hbm_to_vmem [thread:$0]  (!%p2153_p11), %s2151_s17, 128, %s292_s24, %s280_s26  }
  0x4b   : > { %p2717_p10 = scmp.ne.s32.totalorder %s2709_s13, 0 }
  0x4c   : > { %s2174_s3 = sand.u32 (!%p2717_p10), 1, %s1980_s28   ;;  %p2718_p9 = scmp.ne.s32.totalorder (!%p2717_p10), %s2707_s11, 0 }
  0x4d   : > { %300 = sbr.rel (%p2717_p10) target bundleno = 3027 (0xbd3), region = 52  ;;  %s1676_s10 = sshll.u32 (!%p2717_p10), %s2174_s3, 3 }
  0x4e   : > { %s303_s6 = scalar_lea.sflag (!%p2717_p10), [#allocation3], %s2174_s3  ;;  %s2180_s14 = scalar_lea.vmem (!%p2717_p10), [#allocation2], %s1676_s10 }
  0x52   : > { %1963 = dma.done.wait (%p2718_p9), %s303_s6, 128  }
  0x53   : > { %1965 = vsyncadd (%p2718_p9), %s303_s6, 4294967168  ;;  %p2719_p11 = scmp.eq.s32.totalorder %s2077_s9, 0 }
  0x55   : > { %1967 = dma.done.wait (%p2719_p11), [#allocation6], 128   ;;  %p2720_p5 = pmov %p2719_p11 }
  0x56   : > { %v348_v0 = vlaneseq  ;;  %v1993_v1 = vmov 0.0   ;;  %v347_v6 = vld [vmem:[%s2180_s14] sm:$0xff]  ;;  %s1994_s11 = smov 17   ;;  %s1995_s13 = smov 34   ;;  %vm394_vm4 = vcmask 138240   ;;  %vm459_vm5 = vcmask 277504  }
  0x57   : > { %1969 = vsyncadd (%p2720_p5), [#allocation6], 4294967168  ;;  %660 = vmatprep.mubr.f32.mxu0 %v1993_v1  ;;  %884 = vmatprep.mubr.f32.mxu1 %v1993_v1  ;;  %v389_v8 = vcombine.high %v347_v6, %v347_v6  ;;  %s1996_s17 = smov 18   ;;  %s1997_s24 = smov 32   ;;  %vm447_vm6 = vcmask 261120   ;;  %vm409_vm7 = vcmask 15360  }
  0x58   : > { %v349_v2 = vand.u32 127, %v348_v0  ;;  %390 = vrot.lane.b32.xlu0 %v347_v6, %s1994_s11  ;;  %s1998_s25 = smov 16   ;;  %s1999_s26 = smov 2   ;;  %vm435_vm8 = vcmask 146432   ;;  %vm423_vm9 = vcmask 130048   ;;  %vm576_vm10 = vcmask 769024  }
  0x59   : > { %s2000_s21 = smov 111   ;;  %s2001_s22 = smov 94   ;;  %vm579_vm11 = vcmask 1043456   ;;  %vm562_vm12 = vcmask 777216   ;;  %vm551_vm13 = vcmask 785408   ;;  %vm520_vm14 = vcmask 908288  }
  0x5a   : > { %v350_v3 = vadd.s32 128, %v349_v2  ;;  %v355_v4 = vand.u32 15, %v349_v2  ;;  %s2002_s23 = smov 95   ;;  %s2003_s18 = smov 96   ;;  %vm537_vm15 = vcmask 900096  }
  0x5b   : > { %s2004_s20 = smov 126   ;;  %s2005_s16 = smov 110  }
  0x5c   : > { %v362_v5 = vand.u32 15, %v350_v3  ;;  %vm375_vm0 = vcmp.gt.s32.totalorder %v355_v4, 0  ;;  %vm381_vm1 = vcmp.lt.s32.totalorder %v355_v4, 15  ;;  %392 = vrot.lane.b32.xlu0 %v389_v8, %s1994_s11  ;;  %s2006_s6 = smov 127   ;;  %p2721_p0 = scmp.ne.s32.totalorder %s2715_s15, 0 }
  0x5d   : > { %v1682_v7 = vsel %vm381_vm1, 1.0, %v1993_v1  ;;  %v2196_v9 = vsel %vm375_vm0, 1.0, %v1993_v1  ;;  %vm492_vm0 = vcmask 1031168   ;;  %vm509_vm1 = vcmask 916480  }
  0x5e   : > { %vm382_vm2 = vcmp.lt.s32.totalorder %v362_v5, 15  ;;  %vm376_vm3 = vcmp.gt.s32.totalorder %v362_v5, 0 }
  0x5f   : > { %v1683_v10 = vsel %vm382_vm2, 1.0, %v1993_v1  ;;  %v2200_v11 = vsel %vm376_vm3, 1.0, %v1993_v1  ;;  %vm478_vm2 = vcmask 1039360   ;;  %vm588_vm3 = vcmask 293888  }
  0x60   : > { %v1805_v12 = vpack.i.bf16 %v1683_v10, %v1682_v7  ;;  %v1815_v13 = vpack.i.bf16 %v2200_v11, %v2196_v9 }
  0x62   : > { %1806 = vrot.lane.b32.xlu1 %v1805_v12, %s1995_s13  ;;  %1816 = vrot.lane.b32.xlu0 %v1815_v13, %s1997_s24  ;;  %s2007_s13 = smov 112  }
  0x66   : > { %1811 = vrot.lane.b32.xlu1 %v1805_v12, %s1996_s17  ;;  %1826 = vrot.lane.b32.xlu0 %v1805_v12, %s1999_s26  ;;  %s1564_s26 = scalar_lea.sflag [#allocation4], %s2174_s3 }
  0x6a   : > { %1821 = vrot.lane.b32.xlu1 %v1815_v13, %s1998_s25 }
  0xca   : > { %v391_v14 = vpop.permute.xlu0 %390 }
  0xcb   : > { %v2206_v15 = vsel %vm394_vm4, 0.0, %v391_v14 }
  0xcc   : > { %514 = vrot.lane.b32.xlu0 %v2206_v15, %s2000_s21  ;;  %v469_v22 = vrot.slane %v2206_v15, 4 }
  0xce   : > { %v393_v17 = vpop.permute.xlu0 %392 }
  0xcf   : > { %v2229_v27 = vsel %vm394_vm4, %v391_v14, %v393_v17  ;;  %v400_v28 = vsel %vm394_vm4, %v393_v17, 0.0 }
  0xd0   : > { %v470_v39 = vrot.slane %v2229_v27, 4  ;;  %v471_v44 = vrot.slane %v400_v28, 4 }
  0xd4   : > { %v1807_v16 = vpop.permute.xlu1 %1806  ;;  %v1817_v20 = vpop.permute.xlu0 %1816 }
  0xd5   : > { %v2210_v18 = vunpack.i.l.bf16 %v1807_v16  ;;  %v2214_v21 = vunpack.i.l.bf16 %v1817_v20  ;;  %v2220_v24 = vunpack.i.h.bf16 %v1807_v16  ;;  %v2232_v29 = vunpack.i.h.bf16 %v1817_v20 }
  0xd7   : > { %v464_v19 = vmul.f32 %v2210_v18, %v2206_v15  ;;  %v452_v23 = vmul.f32 %v2214_v21, %v2206_v15  ;;  %v2236_v30 = vsel %vm459_vm5, %v2210_v18, %v2220_v24  ;;  %v2247_v34 = vsel %vm447_vm6, %v2214_v21, %v2232_v29 }
  0xd8   : > { %v1827_v25 = vpop.permute.xlu0 %1826  ;;  %v465_v31 = vmul.f32 %v2236_v30, %v2229_v27  ;;  %v1812_v33 = vpop.permute.xlu1 %1811  ;;  %v466_v36 = vmul.f32 %v2220_v24, %v400_v28  ;;  %v453_v37 = vmul.f32 %v2247_v34, %v2229_v27  ;;  %v454_v38 = vmul.f32 %v2232_v29, %v400_v28 }
  0xd9   : > { %570 = vrot.lane.b32.xlu1 %v464_v19, %s2001_s22  ;;  %545 = vrot.lane.b32.xlu0 %v452_v23, %s2003_s18  ;;  %v2226_v26 = vunpack.i.l.bf16 %v1827_v25  ;;  %v2251_v35 = vunpack.i.l.bf16 %v1812_v33  ;;  %v2262_v42 = vunpack.i.h.bf16 %v1827_v25  ;;  %v2268_v46 = vunpack.i.h.bf16 %v1812_v33 }
  0xda   : > { %vm1384_vm5 = vcmask 31744  }
  0xdb   : > { %v414_v32 = vmul.f32 %v2226_v26, %v2206_v15  ;;  %v440_v40 = vmul.f32 %v2251_v35, %v2206_v15  ;;  %v2272_v47 = vsel %vm409_vm7, %v2226_v26, %v2262_v42  ;;  %v416_v49 = vmul.f32 %v2262_v42, %v400_v28 }
  0xdc   : > { %v1822_v41 = vpop.permute.xlu1 %1821  ;;  %v415_v48 = vmul.f32 %v2272_v47, %v2229_v27  ;;  %v2285_v52 = vsel %vm435_vm8, %v2251_v35, %v2268_v46  ;;  %v442_v55 = vmul.f32 %v2268_v46, %v400_v28 }
  0xdd   : > { %556 = vrot.lane.b32.xlu1 %v469_v22, %s2002_s23  ;;  %516 = vrot.lane.b32.xlu0 %v2229_v27, %s2000_s21  ;;  %v2266_v43 = vunpack.i.l.bf16 %v1822_v41  ;;  %v528_v45 = vrot.slane %v440_v40, 4  ;;  %v2281_v51 = vunpack.i.h.bf16 %v1822_v41  ;;  %v441_v54 = vmul.f32 %v2285_v52, %v2229_v27 }
  0xde   : > { %v530_v58 = vrot.slane %v442_v55, 4 }
  0xdf   : > { %v428_v50 = vmul.f32 %v2266_v43, %v2206_v15  ;;  %v2294_v56 = vsel %vm423_vm9, %v2266_v43, %v2281_v51  ;;  %v529_v57 = vrot.slane %v441_v54, 4  ;;  %v430_v60 = vmul.f32 %v2281_v51, %v400_v28 }
  0xe0   : > { %v429_v59 = vmul.f32 %v2294_v56, %v2229_v27 }
  0xe1   : > { %518 = vrot.lane.b32.xlu1 %v400_v28, %s2000_s21  ;;  %486 = vrot.lane.b32.xlu0 %v414_v32, %s2004_s20  ;;  %v500_v53 = vrot.slane %v428_v50, 4  ;;  %v502_v62 = vrot.slane %v430_v60, 4 }
  0xe2   : > { %v501_v61 = vrot.slane %v429_v59, 4 }
  0xe5   : > { %572 = vrot.lane.b32.xlu1 %v465_v31, %s2001_s22  ;;  %574 = vrot.lane.b32.xlu0 %v466_v36, %s2001_s22 }
  0xe9   : > { %547 = vrot.lane.b32.xlu1 %v453_v37, %s2003_s18  ;;  %549 = vrot.lane.b32.xlu0 %v454_v38, %s2003_s18 }
  0xed   : > { %558 = vrot.lane.b32.xlu1 %v470_v39, %s2002_s23  ;;  %560 = vrot.lane.b32.xlu0 %v471_v44, %s2002_s23 }
  0xf1   : > { %531 = vrot.lane.b32.xlu1 %v528_v45, %s2005_s16  ;;  %488 = vrot.lane.b32.xlu0 %v415_v48, %s2004_s20 }
  0xf5   : > { %490 = vrot.lane.b32.xlu1 %v416_v49, %s2004_s20  ;;  %474 = vrot.lane.b32.xlu0 %v470_v39, %s2006_s6 }
  0xf9   : > { %503 = vrot.lane.b32.xlu1 %v500_v53, %s2007_s13  ;;  %533 = vrot.lane.b32.xlu0 %v529_v57, %s2005_s16 }
  0xfd   : > { %535 = vrot.lane.b32.xlu1 %v530_v58, %s2005_s16  ;;  %505 = vrot.lane.b32.xlu0 %v501_v61, %s2007_s13 }
 0x101   : > { %507 = vrot.lane.b32.xlu1 %v502_v62, %s2007_s13  ;;  %472 = vrot.lane.b32.xlu0 %v469_v22, %s2006_s6 }
 0x105   : > { %476 = vrot.lane.b32.xlu1 %v471_v44, %s2006_s6 }
 0x13e   : > { %v515_v63 = vpop.permute.xlu0 %514 }
 0x14b   : > { %v571_v0 = vpop.permute.xlu1 %570  ;;  %v546_v3 = vpop.permute.xlu0 %545 }
 0x14f   : > { %v557_v2 = vpop.permute.xlu1 %556  ;;  %v517_v5 = vpop.permute.xlu0 %516 }
 0x150   : > { %v521_v40 = vsel %vm520_vm14, %v515_v63, %v517_v5  ;;  %v402_v63 = vmul.f32 %v2200_v11, %v2229_v27 }
 0x153   : > { %v519_v4 = vpop.permute.xlu1 %518  ;;  %v487_v7 = vpop.permute.xlu0 %486 }
 0x154   : > { %v522_v41 = vsel %vm520_vm14, %v517_v5, %v519_v4 }
 0x157   : > { %v573_v6 = vpop.permute.xlu1 %572  ;;  %v575_v8 = vpop.permute.xlu0 %574 }
 0x158   : > { %v578_v12 = vsel %vm576_vm10, %v573_v6, %v575_v8  ;;  %v577_v13 = vsel %vm576_vm10, %v571_v0, %v573_v6  ;;  %v401_v0 = vmul.f32 %v2196_v9, %v2206_v15  ;;  %v387_v6 = vld [vmem:[%s2693_s1] sm:$0xf] }
 0x159   : > { %1684 = vmatprep.subr.msk.mxu0 %vm579_vm11, %v578_v12 }
 0x15a   : > { %1685 = vmatpush1.msk.msra.mxu0 %vm579_vm11, %v577_v13 }
 0x15b   : > { %v548_v10 = vpop.permute.xlu1 %547  ;;  %v550_v14 = vpop.permute.xlu0 %549 }
 0x15c   : > { %v553_v22 = vsel %vm551_vm13, %v548_v10, %v550_v14  ;;  %v552_v25 = vsel %vm551_vm13, %v546_v3, %v548_v10 }
 0x15f   : > { %v559_v16 = vpop.permute.xlu1 %558  ;;  %v561_v19 = vpop.permute.xlu0 %560 }
 0x160   : > { %v563_v17 = vsel %vm562_vm12, %v557_v2, %v559_v16  ;;  %v564_v23 = vsel %vm562_vm12, %v559_v16, %v561_v19 }
 0x161   : > { %v587_v28 = vsel %vm579_vm11, %v553_v22, %v564_v23  ;;  %v586_v31 = vsel %vm579_vm11, %v552_v25, %v563_v17 }
 0x162   : > { %620 = vmatprep.subr.mxu0 %v587_v28 }
 0x163   : > { %v532_v20 = vpop.permute.xlu1 %531  ;;  %v489_v32 = vpop.permute.xlu0 %488  ;;  %621 = vmatpush1.msra.mxu0 %v586_v31 }
 0x164   : > { %v493_v54 = vsel %vm492_vm0, %v487_v7, %v489_v32 }
 0x167   : > { %v491_v33 = vpop.permute.xlu1 %490  ;;  %v475_v36 = vpop.permute.xlu0 %474 }
 0x168   : > { %v494_v55 = vsel %vm492_vm0, %v489_v32, %v491_v33 }
 0x16b   : > { %v504_v37 = vpop.permute.xlu1 %503  ;;  %v534_v38 = vpop.permute.xlu0 %533 }
 0x16c   : > { %v538_v44 = vsel %vm537_vm15, %v532_v20, %v534_v38 }
 0x16d   : > { %v584_v49 = vsel %vm579_vm11, %v521_v40, %v538_v44 }
 0x16f   : > { %v536_v39 = vpop.permute.xlu1 %535  ;;  %v506_v50 = vpop.permute.xlu0 %505 }
 0x170   : > { %v539_v45 = vsel %vm537_vm15, %v534_v38, %v536_v39  ;;  %v510_v57 = vsel %vm509_vm1, %v504_v37, %v506_v50 }
 0x171   : > { %v585_v48 = vsel %vm579_vm11, %v522_v41, %v539_v45  ;;  %v582_v60 = vsel %vm579_vm11, %v493_v54, %v510_v57 }
 0x172   : > { %622 = vmatprep.subr.mxu0 %v585_v48 }
 0x173   : > { %623 = vmatpush1.msra.mxu0 %v584_v49  ;;  %v508_v53 = vpop.permute.xlu1 %507  ;;  %v473_v61 = vpop.permute.xlu0 %472 }
 0x174   : > { %v511_v58 = vsel %vm509_vm1, %v506_v50, %v508_v53  ;;  %v479_v2 = vsel %vm478_vm2, %v473_v61, %v475_v36 }
 0x175   : > { %v583_v59 = vsel %vm579_vm11, %v494_v55, %v511_v58  ;;  %v580_v5 = vsel %vm579_vm11, %v401_v0, %v479_v2 }
 0x176   : > { %624 = vmatprep.subr.mxu0 %v583_v59 }
 0x177   : > { %625 = vmatpush1.msra.mxu0 %v582_v60  ;;  %v477_v62 = vpop.permute.xlu1 %476 }
 0x178   : > { %v480_v3 = vsel %vm478_vm2, %v475_v36, %v477_v62 }
 0x179   : > { %v581_v4 = vsel %vm579_vm11, %v402_v63, %v480_v3 }
 0x17a   : > { %626 = vmatprep.subr.mxu0 %v581_v4 }
 0x17b   : > { %627 = vmatpush1.msra.mxu0 %v580_v5 }
 0x17c   : > { %1686 = vmatmul.mubr.msk.f32.vlgmr.msra.gmra.mxu0 %vm588_vm3, %v387_v6 }
 0x17d   : > { %1108 = vmatprep.mubr.f32.mxu0 %v1993_v1 }
 0x23c   : > { %v662_v15 = vpop.f32.mrf.mxu0 }
 0x23d   : > { %v667_v27 = vmul.f32 0.2, %v662_v15 }
 0x23e   : > { %v664_v7 = vpop.f32.mrf.mxu0 }
 0x23f   : > { %v669_v8 = vmax.f32 %v662_v15, %v667_v27  ;;  %v668_v10 = vmul.f32 0.2, %v664_v7 }
 0x241   : > { %v670_v12 = vmax.f32 %v664_v7, %v668_v10  ;;  %674 = vrot.lane.b32.xlu1 %v669_v8, %s1994_s11 }
 0x243   : > { %676 = vrot.lane.b32.xlu0 %v670_v12, %s1994_s11 }
 0x2b3   : > { %v675_v13 = vpop.permute.xlu1 %674 }
 0x2b4   : > { %v2347_v14 = vsel %vm394_vm4, 0.0, %v675_v13 }
 0x2b5   : > { %745 = vrot.lane.b32.xlu0 %v2347_v14, %s2000_s21  ;;  %v698_v16 = vmul.f32 %v2210_v18, %v2347_v14  ;;  %v695_v17 = vmul.f32 %v2214_v21, %v2347_v14  ;;  %v677_v19 = vpop.permute.xlu0 %676  ;;  %v703_v20 = vrot.slane %v2347_v14, 4  ;;  %v686_v25 = vmul.f32 %v2226_v26, %v2347_v14 }
 0x2b6   : > { %v2360_v22 = vsel %vm394_vm4, %v675_v13, %v677_v19  ;;  %v683_v23 = vsel %vm394_vm4, %v677_v19, 0.0  ;;  %v692_v37 = vmul.f32 %v2251_v35, %v2347_v14  ;;  %v689_v44 = vmul.f32 %v2266_v43, %v2347_v14 }
 0x2b7   : > { %797 = vrot.lane.b32.xlu1 %v698_v16, %s2001_s22  ;;  %v699_v28 = vmul.f32 %v2360_v22, %v2236_v30  ;;  %v700_v31 = vmul.f32 %v2220_v24, %v683_v23  ;;  %v696_v32 = vmul.f32 %v2360_v22, %v2247_v34  ;;  %v697_v33 = vmul.f32 %v2232_v29, %v683_v23 }
 0x2b8   : > { %v704_v36 = vrot.slane %v2360_v22, 4  ;;  %v705_v38 = vrot.slane %v683_v23, 4  ;;  %v758_v39 = vrot.slane %v692_v37, 4  ;;  %v687_v40 = vmul.f32 %v2360_v22, %v2272_v47 }
 0x2b9   : > { %774 = vrot.lane.b32.xlu0 %v695_v17, %s2003_s18  ;;  %v688_v41 = vmul.f32 %v2262_v42, %v683_v23  ;;  %v693_v45 = vmul.f32 %v2360_v22, %v2285_v52  ;;  %v732_v48 = vrot.slane %v689_v44, 4  ;;  %v694_v49 = vmul.f32 %v2268_v46, %v683_v23 }
 0x2ba   : > { %v690_v53 = vmul.f32 %v2360_v22, %v2294_v56  ;;  %v691_v55 = vmul.f32 %v2281_v51, %v683_v23 }
 0x2bb   : > { %784 = vrot.lane.b32.xlu1 %v703_v20, %s2002_s23  ;;  %v759_v50 = vrot.slane %v693_v45, 4  ;;  %v760_v54 = vrot.slane %v694_v49, 4 }
 0x2bc   : > { %v733_v57 = vrot.slane %v690_v53, 4  ;;  %v734_v58 = vrot.slane %v691_v55, 4 }
 0x2bd   : > { %747 = vrot.lane.b32.xlu0 %v2360_v22, %s2000_s21 }
 0x2bf   : > { %749 = vrot.lane.b32.xlu1 %v683_v23, %s2000_s21 }
 0x2c1   : > { %719 = vrot.lane.b32.xlu0 %v686_v25, %s2004_s20 }
 0x2c3   : > { %799 = vrot.lane.b32.xlu1 %v699_v28, %s2001_s22 }
 0x2c5   : > { %801 = vrot.lane.b32.xlu0 %v700_v31, %s2001_s22 }
 0x2c7   : > { %776 = vrot.lane.b32.xlu1 %v696_v32, %s2003_s18 }
 0x2c9   : > { %778 = vrot.lane.b32.xlu0 %v697_v33, %s2003_s18 }
 0x2cb   : > { %786 = vrot.lane.b32.xlu1 %v704_v36, %s2002_s23 }
 0x2cd   : > { %788 = vrot.lane.b32.xlu0 %v705_v38, %s2002_s23 }
 0x2cf   : > { %761 = vrot.lane.b32.xlu1 %v758_v39, %s2005_s16 }
 0x2d1   : > { %721 = vrot.lane.b32.xlu0 %v687_v40, %s2004_s20 }
 0x2d3   : > { %723 = vrot.lane.b32.xlu1 %v688_v41, %s2004_s20 }
 0x2d5   : > { %708 = vrot.lane.b32.xlu0 %v704_v36, %s2006_s6 }
 0x2d7   : > { %735 = vrot.lane.b32.xlu1 %v732_v48, %s2007_s13 }
 0x2d9   : > { %763 = vrot.lane.b32.xlu0 %v759_v50, %s2005_s16 }
 0x2db   : > { %765 = vrot.lane.b32.xlu1 %v760_v54, %s2005_s16 }
 0x2dd   : > { %737 = vrot.lane.b32.xlu0 %v733_v57, %s2007_s13 }
 0x2df   : > { %739 = vrot.lane.b32.xlu1 %v734_v58, %s2007_s13 }
 0x2e1   : > { %706 = vrot.lane.b32.xlu0 %v703_v20, %s2006_s6 }
 0x2e3   : > { %710 = vrot.lane.b32.xlu1 %v705_v38, %s2006_s6 }
 0x327   : > { %v746_v59 = vpop.permute.xlu0 %745 }
 0x329   : > { %v798_v60 = vpop.permute.xlu1 %797 }
 0x32b   : > { %v775_v61 = vpop.permute.xlu0 %774 }
 0x32d   : > { %v785_v62 = vpop.permute.xlu1 %784 }
 0x32f   : > { %v748_v63 = vpop.permute.xlu0 %747 }
 0x330   : > { %v751_v39 = vsel %vm520_vm14, %v746_v59, %v748_v63 }
 0x331   : > { %v750_v0 = vpop.permute.xlu1 %749 }
 0x332   : > { %v752_v37 = vsel %vm520_vm14, %v748_v63, %v750_v0  ;;  %v671_v0 = vld [vmem:[%s2694_s2] sm:$0xf] }
 0x333   : > { %v720_v2 = vpop.permute.xlu0 %719 }
 0x335   : > { %v800_v3 = vpop.permute.xlu1 %799 }
 0x336   : > { %v803_v15 = vsel %vm576_vm10, %v798_v60, %v800_v3  ;;  %v685_v60 = vmul.f32 %v2200_v11, %v2360_v22 }
 0x337   : > { %v802_v4 = vpop.permute.xlu0 %801 }
 0x338   : > { %v804_v5 = vsel %vm576_vm10, %v800_v3, %v802_v4 }
 0x339   : > { %v777_v6 = vpop.permute.xlu1 %776  ;;  %1687 = vmatprep.subr.msk.mxu1 %vm579_vm11, %v804_v5 }
 0x33a   : > { %1688 = vmatpush1.msk.msra.mxu1 %vm579_vm11, %v803_v15  ;;  %v780_v16 = vsel %vm551_vm13, %v775_v61, %v777_v6 }
 0x33b   : > { %v779_v27 = vpop.permute.xlu0 %778 }
 0x33c   : > { %v781_v12 = vsel %vm551_vm13, %v777_v6, %v779_v27 }
 0x33d   : > { %v787_v7 = vpop.permute.xlu1 %786 }
 0x33e   : > { %v790_v8 = vsel %vm562_vm12, %v785_v62, %v787_v7  ;;  %v684_v62 = vmul.f32 %v2196_v9, %v2347_v14 }
 0x33f   : > { %v789_v10 = vpop.permute.xlu0 %788  ;;  %v811_v20 = vsel %vm579_vm11, %v780_v16, %v790_v8 }
 0x340   : > { %v791_v13 = vsel %vm562_vm12, %v787_v7, %v789_v10 }
 0x341   : > { %v762_v17 = vpop.permute.xlu1 %761  ;;  %v812_v19 = vsel %vm579_vm11, %v781_v12, %v791_v13 }
 0x342   : > { %844 = vmatprep.subr.mxu1 %v812_v19 }
 0x343   : > { %845 = vmatpush1.msra.mxu1 %v811_v20  ;;  %v722_v23 = vpop.permute.xlu0 %721 }
 0x344   : > { %v725_v53 = vsel %vm492_vm0, %v720_v2, %v722_v23 }
 0x345   : > { %v724_v25 = vpop.permute.xlu1 %723 }
 0x346   : > { %v726_v49 = vsel %vm492_vm0, %v722_v23, %v724_v25 }
 0x347   : > { %v709_v28 = vpop.permute.xlu0 %708 }
 0x349   : > { %v736_v31 = vpop.permute.xlu1 %735 }
 0x34b   : > { %v764_v32 = vpop.permute.xlu0 %763 }
 0x34c   : > { %v767_v33 = vsel %vm537_vm15, %v762_v17, %v764_v32 }
 0x34d   : > { %v766_v36 = vpop.permute.xlu1 %765  ;;  %v809_v44 = vsel %vm579_vm11, %v751_v39, %v767_v33 }
 0x34e   : > { %v768_v38 = vsel %vm537_vm15, %v764_v32, %v766_v36 }
 0x34f   : > { %v738_v40 = vpop.permute.xlu0 %737  ;;  %v810_v41 = vsel %vm579_vm11, %v752_v37, %v768_v38 }
 0x350   : > { %846 = vmatprep.subr.mxu1 %v810_v41  ;;  %v741_v45 = vsel %vm509_vm1, %v736_v31, %v738_v40 }
 0x351   : > { %v740_v48 = vpop.permute.xlu1 %739  ;;  %847 = vmatpush1.msra.mxu1 %v809_v44  ;;  %v807_v57 = vsel %vm579_vm11, %v725_v53, %v741_v45 }
 0x352   : > { %v742_v50 = vsel %vm509_vm1, %v738_v40, %v740_v48 }
 0x353   : > { %v707_v54 = vpop.permute.xlu0 %706  ;;  %v808_v55 = vsel %vm579_vm11, %v726_v49, %v742_v50 }
 0x354   : > { %848 = vmatprep.subr.mxu1 %v808_v55  ;;  %v712_v58 = vsel %vm478_vm2, %v707_v54, %v709_v28 }
 0x355   : > { %v711_v59 = vpop.permute.xlu1 %710  ;;  %849 = vmatpush1.msra.mxu1 %v807_v57  ;;  %v805_v2 = vsel %vm579_vm11, %v684_v62, %v712_v58 }
 0x356   : > { %v713_v61 = vsel %vm478_vm2, %v709_v28, %v711_v59 }
 0x357   : > { %v806_v63 = vsel %vm579_vm11, %v685_v60, %v713_v61 }
 0x358   : > { %850 = vmatprep.subr.mxu1 %v806_v63 }
 0x359   : > { %851 = vmatpush1.msra.mxu1 %v805_v2 }
 0x35a   : > { %1689 = vmatmul.mubr.msk.f32.vlgmr.msra.gmra.mxu1 %vm588_vm3, %v671_v0 }
 0x35b   : > { %1332 = vmatprep.mubr.f32.mxu1 %v1993_v1 }
 0x41a   : > { %v886_v22 = vpop.f32.mrf.mxu1 }
 0x41b   : > { %v891_v3 = vmul.f32 0.2, %v886_v22 }
 0x41c   : > { %v888_v4 = vpop.f32.mrf.mxu1 }
 0x41d   : > { %v2441_v5 = vmax.f32 %v886_v22, %v891_v3  ;;  %v892_v14 = vmul.f32 0.2, %v888_v4 }
 0x41f   : > { %v2443_v6 = vmax.f32 %v888_v4, %v892_v14  ;;  %898 = vrot.lane.b32.xlu1 %v2441_v5, %s1994_s11 }
 0x421   : > { %900 = vrot.lane.b32.xlu0 %v2443_v6, %s1994_s11 }
 0x491   : > { %v899_v15 = vpop.permute.xlu1 %898 }
 0x492   : > { %v2450_v27 = vsel %vm394_vm4, 0.0, %v899_v15 }
 0x493   : > { %969 = vrot.lane.b32.xlu0 %v2450_v27, %s2000_s21  ;;  %v922_v7 = vmul.f32 %v2210_v18, %v2450_v27  ;;  %v919_v8 = vmul.f32 %v2214_v21, %v2450_v27  ;;  %v901_v10 = vpop.permute.xlu0 %900  ;;  %v927_v12 = vrot.slane %v2450_v27, 4  ;;  %v910_v17 = vmul.f32 %v2226_v26, %v2450_v27 }
 0x494   : > { %v2463_v13 = vsel %vm394_vm4, %v899_v15, %v901_v10  ;;  %v907_v16 = vsel %vm394_vm4, %v901_v10, 0.0  ;;  %v916_v31 = vmul.f32 %v2251_v35, %v2450_v27  ;;  %v913_v38 = vmul.f32 %v2266_v43, %v2450_v27 }
 0x495   : > { %1021 = vrot.lane.b32.xlu1 %v922_v7, %s2001_s22  ;;  %v923_v19 = vmul.f32 %v2463_v13, %v2236_v30  ;;  %v924_v20 = vmul.f32 %v2220_v24, %v907_v16  ;;  %v920_v23 = vmul.f32 %v2463_v13, %v2247_v34  ;;  %v921_v25 = vmul.f32 %v2232_v29, %v907_v16 }
 0x496   : > { %v928_v28 = vrot.slane %v2463_v13, 4  ;;  %v929_v32 = vrot.slane %v907_v16, 4  ;;  %v982_v33 = vrot.slane %v916_v31, 4  ;;  %v911_v36 = vmul.f32 %v2463_v13, %v2272_v47 }
 0x497   : > { %998 = vrot.lane.b32.xlu0 %v919_v8, %s2003_s18  ;;  %v912_v37 = vmul.f32 %v2262_v42, %v907_v16  ;;  %v917_v39 = vmul.f32 %v2463_v13, %v2285_v52  ;;  %v956_v40 = vrot.slane %v913_v38, 4  ;;  %v918_v41 = vmul.f32 %v2268_v46, %v907_v16 }
 0x498   : > { %v914_v45 = vmul.f32 %v2463_v13, %v2294_v56  ;;  %v915_v49 = vmul.f32 %v2281_v51, %v907_v16 }
 0x499   : > { %1008 = vrot.lane.b32.xlu1 %v927_v12, %s2002_s23  ;;  %v983_v44 = vrot.slane %v917_v39, 4  ;;  %v984_v48 = vrot.slane %v918_v41, 4 }
 0x49a   : > { %v957_v50 = vrot.slane %v914_v45, 4  ;;  %v958_v53 = vrot.slane %v915_v49, 4 }
 0x49b   : > { %971 = vrot.lane.b32.xlu0 %v2463_v13, %s2000_s21 }
 0x49d   : > { %973 = vrot.lane.b32.xlu1 %v907_v16, %s2000_s21 }
 0x49f   : > { %943 = vrot.lane.b32.xlu0 %v910_v17, %s2004_s20 }
 0x4a1   : > { %1023 = vrot.lane.b32.xlu1 %v923_v19, %s2001_s22 }
 0x4a3   : > { %1025 = vrot.lane.b32.xlu0 %v924_v20, %s2001_s22 }
 0x4a5   : > { %1000 = vrot.lane.b32.xlu1 %v920_v23, %s2003_s18 }
 0x4a7   : > { %1002 = vrot.lane.b32.xlu0 %v921_v25, %s2003_s18 }
 0x4a9   : > { %1010 = vrot.lane.b32.xlu1 %v928_v28, %s2002_s23 }
 0x4ab   : > { %1012 = vrot.lane.b32.xlu0 %v929_v32, %s2002_s23 }
 0x4ad   : > { %985 = vrot.lane.b32.xlu1 %v982_v33, %s2005_s16 }
 0x4af   : > { %945 = vrot.lane.b32.xlu0 %v911_v36, %s2004_s20 }
 0x4b1   : > { %947 = vrot.lane.b32.xlu1 %v912_v37, %s2004_s20 }
 0x4b3   : > { %932 = vrot.lane.b32.xlu0 %v928_v28, %s2006_s6 }
 0x4b5   : > { %959 = vrot.lane.b32.xlu1 %v956_v40, %s2007_s13 }
 0x4b7   : > { %987 = vrot.lane.b32.xlu0 %v983_v44, %s2005_s16 }
 0x4b9   : > { %989 = vrot.lane.b32.xlu1 %v984_v48, %s2005_s16 }
 0x4bb   : > { %961 = vrot.lane.b32.xlu0 %v957_v50, %s2007_s13 }
 0x4bd   : > { %963 = vrot.lane.b32.xlu1 %v958_v53, %s2007_s13 }
 0x4bf   : > { %930 = vrot.lane.b32.xlu0 %v927_v12, %s2006_s6 }
 0x4c1   : > { %934 = vrot.lane.b32.xlu1 %v929_v32, %s2006_s6 }
 0x505   : > { %v970_v54 = vpop.permute.xlu0 %969 }
 0x507   : > { %v1022_v55 = vpop.permute.xlu1 %1021 }
 0x509   : > { %v999_v57 = vpop.permute.xlu0 %998 }
 0x50b   : > { %v1009_v58 = vpop.permute.xlu1 %1008 }
 0x50d   : > { %v972_v59 = vpop.permute.xlu0 %971 }
 0x50e   : > { %v975_v37 = vsel %vm520_vm14, %v970_v54, %v972_v59 }
 0x50f   : > { %v974_v60 = vpop.permute.xlu1 %973 }
 0x510   : > { %v976_v33 = vsel %vm520_vm14, %v972_v59, %v974_v60  ;;  %v908_v60 = vmul.f32 %v2196_v9, %v2450_v27 }
 0x511   : > { %v944_v61 = vpop.permute.xlu0 %943 }
 0x513   : > { %v1024_v62 = vpop.permute.xlu1 %1023 }
 0x514   : > { %v1027_v2 = vsel %vm576_vm10, %v1022_v55, %v1024_v62 }
 0x515   : > { %v1026_v63 = vpop.permute.xlu0 %1025 }
 0x516   : > { %v1028_v0 = vsel %vm576_vm10, %v1024_v62, %v1026_v63  ;;  %v895_v62 = vld [vmem:[#allocation5] sm:$0xf] }
 0x517   : > { %v1001_v22 = vpop.permute.xlu1 %1000  ;;  %1690 = vmatprep.subr.msk.mxu0 %vm579_vm11, %v1028_v0 }
 0x518   : > { %1691 = vmatpush1.msk.msra.mxu0 %vm579_vm11, %v1027_v2  ;;  %v1004_v10 = vsel %vm551_vm13, %v999_v57, %v1001_v22 }
 0x519   : > { %v1003_v3 = vpop.permute.xlu0 %1002 }
 0x51a   : > { %v1005_v7 = vsel %vm551_vm13, %v1001_v22, %v1003_v3 }
 0x51b   : > { %v1011_v4 = vpop.permute.xlu1 %1010 }
 0x51c   : > { %v1014_v14 = vsel %vm562_vm12, %v1009_v58, %v1011_v4  ;;  %v909_v58 = vmul.f32 %v2200_v11, %v2463_v13 }
 0x51d   : > { %v1013_v15 = vpop.permute.xlu0 %1012  ;;  %v1035_v17 = vsel %vm579_vm11, %v1004_v10, %v1014_v14 }
 0x51e   : > { %v1015_v8 = vsel %vm562_vm12, %v1011_v4, %v1013_v15 }
 0x51f   : > { %v986_v12 = vpop.permute.xlu1 %985  ;;  %v1036_v16 = vsel %vm579_vm11, %v1005_v7, %v1015_v8 }
 0x520   : > { %1068 = vmatprep.subr.mxu0 %v1036_v16 }
 0x521   : > { %1069 = vmatpush1.msra.mxu0 %v1035_v17  ;;  %v946_v19 = vpop.permute.xlu0 %945 }
 0x522   : > { %v949_v49 = vsel %vm492_vm0, %v944_v61, %v946_v19 }
 0x523   : > { %v948_v20 = vpop.permute.xlu1 %947 }
 0x524   : > { %v950_v45 = vsel %vm492_vm0, %v946_v19, %v948_v20 }
 0x525   : > { %v933_v23 = vpop.permute.xlu0 %932 }
 0x527   : > { %v960_v25 = vpop.permute.xlu1 %959 }
 0x529   : > { %v988_v28 = vpop.permute.xlu0 %987 }
 0x52a   : > { %v991_v31 = vsel %vm537_vm15, %v986_v12, %v988_v28 }
 0x52b   : > { %v990_v32 = vpop.permute.xlu1 %989  ;;  %v1033_v40 = vsel %vm579_vm11, %v975_v37, %v991_v31 }
 0x52c   : > { %v992_v36 = vsel %vm537_vm15, %v988_v28, %v990_v32 }
 0x52d   : > { %v962_v38 = vpop.permute.xlu0 %961  ;;  %v1034_v39 = vsel %vm579_vm11, %v976_v33, %v992_v36 }
 0x52e   : > { %1070 = vmatprep.subr.mxu0 %v1034_v39  ;;  %v965_v41 = vsel %vm509_vm1, %v960_v25, %v962_v38 }
 0x52f   : > { %v964_v44 = vpop.permute.xlu1 %963  ;;  %1071 = vmatpush1.msra.mxu0 %v1033_v40  ;;  %v1031_v54 = vsel %vm579_vm11, %v949_v49, %v965_v41 }
 0x530   : > { %v966_v48 = vsel %vm509_vm1, %v962_v38, %v964_v44 }
 0x531   : > { %v931_v50 = vpop.permute.xlu0 %930  ;;  %v1032_v53 = vsel %vm579_vm11, %v950_v45, %v966_v48 }
 0x532   : > { %1072 = vmatprep.subr.mxu0 %v1032_v53  ;;  %v936_v55 = vsel %vm478_vm2, %v931_v50, %v933_v23 }
 0x533   : > { %v935_v57 = vpop.permute.xlu1 %934  ;;  %1073 = vmatpush1.msra.mxu0 %v1031_v54  ;;  %v1029_v63 = vsel %vm579_vm11, %v908_v60, %v936_v55 }
 0x534   : > { %v937_v59 = vsel %vm478_vm2, %v933_v23, %v935_v57 }
 0x535   : > { %v1030_v61 = vsel %vm579_vm11, %v909_v58, %v937_v59 }
 0x536   : > { %1074 = vmatprep.subr.mxu0 %v1030_v61 }
 0x537   : > { %1075 = vmatpush1.msra.mxu0 %v1029_v63 }
 0x538   : > { %1692 = vmatmul.mubr.msk.f32.vlgmr.msra.gmra.mxu0 %vm588_vm3, %v895_v62  ;;  %1711 = vmatprep.subr.mxu0 %v1993_v1 }
 0x5f8   : > { %v1110_v0 = vpop.f32.mrf.mxu0 }
 0x5f9   : > { %v1115_v2 = vmul.f32 0.2, %v1110_v0 }
 0x5fa   : > { %v1112_v22 = vpop.f32.mrf.mxu0 }
 0x5fb   : > { %v1117_v13 = vmax.f32 %v1110_v0, %v1115_v2  ;;  %v1116_v3 = vmul.f32 0.2, %v1112_v22 }
 0x5fd   : > { %v1118_v4 = vmax.f32 %v1112_v22, %v1116_v3  ;;  %1122 = vrot.lane.b32.xlu1 %v1117_v13, %s1994_s11 }
 0x5ff   : > { %1124 = vrot.lane.b32.xlu0 %v1118_v4, %s1994_s11 }
 0x66f   : > { %v1123_v27 = vpop.permute.xlu1 %1122 }
 0x670   : > { %v2544_v14 = vsel %vm394_vm4, 0.0, %v1123_v27 }
 0x671   : > { %1193 = vrot.lane.b32.xlu0 %v2544_v14, %s2000_s21  ;;  %v1146_v15 = vmul.f32 %v2210_v18, %v2544_v14  ;;  %v1143_v7 = vmul.f32 %v2214_v21, %v2544_v14  ;;  %v1125_v8 = vpop.permute.xlu0 %1124  ;;  %v1151_v10 = vrot.slane %v2544_v14, 4  ;;  %v1134_v21 = vmul.f32 %v2226_v26, %v2544_v14 }
 0x672   : > { %v2557_v12 = vsel %vm394_vm4, %v1123_v27, %v1125_v8  ;;  %v1131_v18 = vsel %vm394_vm4, %v1125_v8, 0.0  ;;  %v1137_v25 = vmul.f32 %v2266_v43, %v2544_v14  ;;  %vm2009_vm4 = vmmov 0  }
 0x673   : > { %1245 = vrot.lane.b32.xlu1 %v1146_v15, %s2001_s22  ;;  %v1147_v16 = vmul.f32 %v2557_v12, %v2236_v30  ;;  %v1148_v17 = vmul.f32 %v2220_v24, %v1131_v18  ;;  %v1144_v19 = vmul.f32 %v2557_v12, %v2247_v34  ;;  %v1145_v20 = vmul.f32 %v2232_v29, %v1131_v18 }
 0x674   : > { %v1152_v26 = vrot.slane %v2557_v12, 4  ;;  %v1140_v30 = vmul.f32 %v2251_v35, %v2544_v14  ;;  %v1153_v23 = vrot.slane %v1131_v18, 4  ;;  %v1135_v34 = vmul.f32 %v2557_v12, %v2272_v47  ;;  %1713 = vmatprep.mubr.msk.f32.mxu0 %vm2009_vm4, %v1993_v1 }
 0x675   : > { %1222 = vrot.lane.b32.xlu0 %v1143_v7, %s2003_s18  ;;  %v1136_v29 = vmul.f32 %v2262_v42, %v1131_v18  ;;  %v1141_v35 = vmul.f32 %v2557_v12, %v2285_v52  ;;  %v1180_v28 = vrot.slane %v1137_v25, 4  ;;  %v1142_v31 = vmul.f32 %v2268_v46, %v1131_v18 }
 0x676   : > { %v1206_v24 = vrot.slane %v1140_v30, 4  ;;  %v1138_v32 = vmul.f32 %v2557_v12, %v2294_v56  ;;  %v1139_v43 = vmul.f32 %v2281_v51, %v1131_v18  ;;  %v2008_v52 = vmov 0   ;;  %v1339_v56 = vld [vmem:[%s2697_s5] sm:$0xf] }
 0x677   : > { %1232 = vrot.lane.b32.xlu1 %v1151_v10, %s2002_s23  ;;  %v1207_v47 = vrot.slane %v1141_v35, 4  ;;  %v1208_v42 = vrot.slane %v1142_v31, 4  ;;  %1831 = vset.pattern.permute.xlu0 %v2008_v52  ;;  %v1133_v25 = vmul.f32 %v2200_v11, %v2557_v12 }
 0x678   : > { %v1181_v33 = vrot.slane %v1138_v32, 4  ;;  %1830 = vset.pattern.permute.xlu1 %v2008_v52  ;;  %v1182_v46 = vrot.slane %v1139_v43, 4 }
 0x679   : > { %1195 = vrot.lane.b32.xlu0 %v2557_v12, %s2000_s21 }
 0x67b   : > { %1197 = vrot.lane.b32.xlu1 %v1131_v18, %s2000_s21  ;;  %s2010_s21 = smov [#allocation8]  }
 0x67d   : > { %1167 = vrot.lane.b32.xlu0 %v1134_v21, %s2004_s20 }
 0x67f   : > { %1247 = vrot.lane.b32.xlu1 %v1147_v16, %s2001_s22 }
 0x681   : > { %1249 = vrot.lane.b32.xlu0 %v1148_v17, %s2001_s22 }
 0x683   : > { %1224 = vrot.lane.b32.xlu1 %v1144_v19, %s2003_s18 }
 0x685   : > { %1226 = vrot.lane.b32.xlu0 %v1145_v20, %s2003_s18 }
 0x687   : > { %1234 = vrot.lane.b32.xlu1 %v1152_v26, %s2002_s23 }
 0x689   : > { %1236 = vrot.lane.b32.xlu0 %v1153_v23, %s2002_s23 }
 0x68b   : > { %1209 = vrot.lane.b32.xlu1 %v1206_v24, %s2005_s16 }
 0x68d   : > { %1169 = vrot.lane.b32.xlu0 %v1135_v34, %s2004_s20 }
 0x68f   : > { %1171 = vrot.lane.b32.xlu1 %v1136_v29, %s2004_s20 }
 0x691   : > { %1156 = vrot.lane.b32.xlu0 %v1152_v26, %s2006_s6 }
 0x693   : > { %1183 = vrot.lane.b32.xlu1 %v1180_v28, %s2007_s13  ;;  %v1132_v28 = vmul.f32 %v2196_v9, %v2544_v14 }
 0x695   : > { %1211 = vrot.lane.b32.xlu0 %v1207_v47, %s2005_s16  ;;  %v1119_v47 = vld [vmem:[%s2696_s4] sm:$0xf] }
 0x697   : > { %1213 = vrot.lane.b32.xlu1 %v1208_v42, %s2005_s16  ;;  %s1706_s16 = sshll.u32 %s2077_s9, 7  ;;  %s1924_s9 = sshll.u32 %s2010_s21, 4  ;;  %s1925_s9 = int_to_ptr.vmem [resolvable:$false] %s1924_s9 }
 0x698   : > { %s1576_s25 = scalar_lea.hbm %s2700_s8, %s1706_s16 }
 0x699   : > { %1185 = vrot.lane.b32.xlu0 %v1181_v33, %s2007_s13 }
 0x69b   : > { %1187 = vrot.lane.b32.xlu1 %v1182_v46, %s2007_s13 }
 0x69d   : > { %1154 = vrot.lane.b32.xlu0 %v1151_v10, %s2006_s6 }
 0x69f   : > { %1158 = vrot.lane.b32.xlu1 %v1153_v23, %s2006_s6  ;;  %s346_s6 = scalar_lea.vmem [#allocation8], %s1676_s10  ;;  %s1926_s10 = scalar_lea.vmem %s1925_s9, 256 }
 0x6a0   : > { %s1578_s13 = sshll.u32 %s346_s6, 4  ;;  %s1579_s13 = int_to_ptr.vmem [resolvable:$true] %s1578_s13 }
 0x6a1   : > { %s1920_s11 = scalar_lea.vmem %s1579_s13, 128  ;;  %p1927_p4 = scmp.lt.s32.totalorder %s1579_s13, %s1925_s9 }
 0x6a2   : > { %p1921_p13 = scmp.ne.s32.totalorder %s1579_s13, %s1920_s11  ;;  %p1928_p6 = scmp.lt.s32.totalorder %s1926_s10, %s1920_s11 }
 0x6a3   : > { %1342 = vperm.xlu1 %1830, %v1339_v56  }
 0x6a4   : > { %p1922_p1 = pnand %p1921_p13, %p2721_p0  ;;  %p1929_p8 = por %p1928_p6, %p1927_p4 }
 0x6a6   : > { %p1923_p2 = pneg %p1922_p1 }
 0x6a8   : > { %p1930_p12 = pnand %p1929_p8, %p1923_p2 }
 0x6e3   : > { %v1194_v51 = vpop.permute.xlu0 %1193 }
 0x6e5   : > { %v1246_v36 = vpop.permute.xlu1 %1245 }
 0x6e7   : > { %v1223_v37 = vpop.permute.xlu0 %1222 }
 0x6e9   : > { %v1233_v38 = vpop.permute.xlu1 %1232 }
 0x6eb   : > { %v1196_v39 = vpop.permute.xlu0 %1195 }
 0x6ec   : > { %v1199_v8 = vsel %vm520_vm14, %v1194_v51, %v1196_v39 }
 0x6ed   : > { %v1198_v40 = vpop.permute.xlu1 %1197 }
 0x6ee   : > { %v1200_v15 = vsel %vm520_vm14, %v1196_v39, %v1198_v40 }
 0x6ef   : > { %v1168_v41 = vpop.permute.xlu0 %1167 }
 0x6f1   : > { %v1248_v44 = vpop.permute.xlu1 %1247 }
 0x6f2   : > { %v1251_v49 = vsel %vm576_vm10, %v1246_v36, %v1248_v44 }
 0x6f3   : > { %v1250_v45 = vpop.permute.xlu0 %1249 }
 0x6f4   : > { %v1252_v48 = vsel %vm576_vm10, %v1248_v44, %v1250_v45 }
 0x6f5   : > { %v1225_v50 = vpop.permute.xlu1 %1224  ;;  %1693 = vmatprep.subr.msk.mxu1 %vm579_vm11, %v1252_v48 }
 0x6f6   : > { %1694 = vmatpush1.msk.msra.mxu1 %vm579_vm11, %v1251_v49  ;;  %v1228_v60 = vsel %vm551_vm13, %v1223_v37, %v1225_v50 }
 0x6f7   : > { %v1227_v53 = vpop.permute.xlu0 %1226 }
 0x6f8   : > { %v1229_v58 = vsel %vm551_vm13, %v1225_v50, %v1227_v53 }
 0x6f9   : > { %v1235_v54 = vpop.permute.xlu1 %1234 }
 0x6fa   : > { %v1238_v55 = vsel %vm562_vm12, %v1233_v38, %v1235_v54 }
 0x6fb   : > { %v1237_v57 = vpop.permute.xlu0 %1236  ;;  %v1259_v63 = vsel %vm579_vm11, %v1228_v60, %v1238_v55 }
 0x6fc   : > { %v1239_v59 = vsel %vm562_vm12, %v1235_v54, %v1237_v57 }
 0x6fd   : > { %v1210_v61 = vpop.permute.xlu1 %1209  ;;  %v1260_v62 = vsel %vm579_vm11, %v1229_v58, %v1239_v59 }
 0x6fe   : > { %1292 = vmatprep.subr.mxu1 %v1260_v62 }
 0x6ff   : > { %1293 = vmatpush1.msra.mxu1 %v1259_v63  ;;  %v1170_v0 = vpop.permute.xlu0 %1169 }
 0x700   : > { %v1173_v26 = vsel %vm492_vm0, %v1168_v41, %v1170_v0 }
 0x701   : > { %v1172_v2 = vpop.permute.xlu1 %1171 }
 0x702   : > { %v1174_v19 = vsel %vm492_vm0, %v1170_v0, %v1172_v2 }
 0x703   : > { %v1157_v22 = vpop.permute.xlu0 %1156 }
 0x705   : > { %v1184_v13 = vpop.permute.xlu1 %1183 }
 0x707   : > { %v1212_v3 = vpop.permute.xlu0 %1211 }
 0x708   : > { %v1215_v4 = vsel %vm537_vm15, %v1210_v61, %v1212_v3 }
 0x709   : > { %v1214_v27 = vpop.permute.xlu1 %1213  ;;  %v1257_v21 = vsel %vm579_vm11, %v1199_v8, %v1215_v4  ;;  %v1383_v4 = vld [vmem:[#allocation7] sm:$0xf] }
 0x70a   : > { %v1216_v7 = vsel %vm537_vm15, %v1212_v3, %v1214_v27 }
 0x70b   : > { %v1186_v10 = vpop.permute.xlu0 %1185  ;;  %v1258_v18 = vsel %vm579_vm11, %v1200_v15, %v1216_v7 }
 0x70c   : > { %1294 = vmatprep.subr.mxu1 %v1258_v18  ;;  %v1189_v16 = vsel %vm509_vm1, %v1184_v13, %v1186_v10  ;;  %v1463_v18 = vld [vmem:[%s2699_s7] sm:$0xf] }
 0x70d   : > { %v1188_v17 = vpop.permute.xlu1 %1187  ;;  %1295 = vmatpush1.msra.mxu1 %v1257_v21  ;;  %v1255_v24 = vsel %vm579_vm11, %v1173_v26, %v1189_v16 }
 0x70e   : > { %v1190_v20 = vsel %vm509_vm1, %v1186_v10, %v1188_v17 }
 0x70f   : > { %v1155_v30 = vpop.permute.xlu0 %1154  ;;  %v1256_v23 = vsel %vm579_vm11, %v1174_v19, %v1190_v20 }
 0x710   : > { %1296 = vmatprep.subr.mxu1 %v1256_v23  ;;  %v1160_v34 = vsel %vm478_vm2, %v1155_v30, %v1157_v22 }
 0x711   : > { %v1159_v29 = vpop.permute.xlu1 %1158  ;;  %1297 = vmatpush1.msra.mxu1 %v1255_v24  ;;  %v1253_v32 = vsel %vm579_vm11, %v1132_v28, %v1160_v34 }
 0x712   : > { %v1161_v35 = vsel %vm478_vm2, %v1157_v22, %v1159_v29 }
 0x713   : > { %v1254_v31 = vsel %vm579_vm11, %v1133_v25, %v1161_v35 }
 0x714   : > { %1298 = vmatprep.subr.mxu1 %v1254_v31 }
 0x715   : > { %1299 = vmatpush1.msra.mxu1 %v1253_v32 }
 0x716   : > { %1695 = vmatmul.mubr.msk.f32.vlgmr.msra.gmra.mxu1 %vm588_vm3, %v1119_v47  ;;  %1716 = vmatprep.subr.mxu1 %v1993_v1  ;;  %v1839_v47 = vld [vmem:[%s2180_s14] sm:$0xff] }
 0x717   : > { %1718 = vmatprep.mubr.msk.f32.mxu1 %vm2009_vm4, %v1993_v1 }
 0x71e   : > { %v1343_v11 = vpop.permute.xlu1 %1342 }
 0x7d6   : > { %v1334_v12 = vpop.f32.mrf.mxu1 }
 0x7d7   : > { %v1345_v42 = vmul.f32 %v1343_v11, %v1334_v12 }
 0x7d8   : > { %v1336_v43 = vpop.f32.mrf.mxu1 }
 0x7d9   : > { %v1347_v9 = vsel %vm579_vm11, %v1345_v42, 0.0  ;;  %v1346_v14 = vmul.f32 %v1343_v11, %v1336_v43 }
 0x7da   : > { %v1348_v33 = vrot.slane %v1347_v9, 4 }
 0x7db   : > { %v1354_v52 = vsel %vm579_vm11, %v1346_v14, 0.0 }
 0x7dc   : > { %v1349_v46 = vadd.f32 %v1348_v33, %v1347_v9  ;;  %v1355_v56 = vrot.slane %v1354_v52, 4 }
 0x7de   : > { %v1350_v51 = vrot.slane %v1349_v46, 2  ;;  %v1356_v36 = vadd.f32 %v1355_v56, %v1354_v52 }
 0x7e0   : > { %v1357_v37 = vrot.slane %v1356_v36, 2  ;;  %v1351_v38 = vadd.f32 %v1350_v51, %v1349_v46 }
 0x7e2   : > { %v1352_v39 = vrot.slane %v1351_v38, 1  ;;  %v1358_v40 = vadd.f32 %v1357_v37, %v1356_v36 }
 0x7e4   : > { %v1359_v41 = vrot.slane %v1358_v40, 1  ;;  %v1353_v44 = vadd.f32 %v1352_v39, %v1351_v38 }
 0x7e6   : > { %v1360_v45 = vadd.f32 %v1359_v41, %v1358_v40 }
 0x7e8   : > { %v1361_v48 = vmax.f32 %v1353_v44, %v1360_v45 }
 0x7ea   : > { %1362 = vmax.xlane.f32.xlu0 %v1361_v48 }
 0x873   : > { %v1363_v49 = vpop.xlane.xlu0 %1362 }
 0x874   : > { %v1364_v50 = vsub.f32 %v1353_v44, %v1363_v49  ;;  %v1365_v53 = vsub.f32 %v1360_v45, %v1363_v49 }
 0x876   : > { %v1366_v54 = vmul.f32 1.442695, %v1364_v50  ;;  %v1368_v55 = vmul.f32 1.442695, %v1365_v53 }
 0x878   : > { %1833 = vpow2.f32 %v1366_v54 }
 0x879   : > { %1835 = vpow2.f32 %v1368_v55 }
 0x885   : > { %v1834_v57 = vpop.eup %1833 }
 0x886   : > { %v1836_v58 = vpop.eup %1835 }
 0x887   : > { %v1370_v59 = vadd.f32 %v1836_v58, %v1834_v57 }
 0x889   : > { %1371 = vadd.xlane.f32.xlu1 %v1370_v59 }
 0x912   : > { %v1372_v60 = vpop.xlane.xlu1 %1371 }
 0x913   : > { %1837 = vrcp.f32 %v1372_v60 }
 0x920   : > { %v1838_v61 = vpop.eup %1837 }
 0x921   : > { %v1374_v62 = vmul.f32 %v1838_v61, %v1834_v57  ;;  %v1375_v63 = vmul.f32 %v1838_v61, %v1836_v58 }
 0x923   : > { %v1376_v0 = vmul.f32 %v1374_v62, %v1334_v12  ;;  %v1377_v2 = vmul.f32 %v1375_v63, %v1336_v43 }
 0x925   : > { %v1378_v22 = vsel %vm579_vm11, %v1376_v0, 0.0  ;;  %v1379_v13 = vsel %vm579_vm11, %v1377_v2, 0.0 }
 0x926   : > { %v1380_v3 = vadd.f32 %v1379_v13, %v1378_v22 }
 0x928   : > { %1381 = vadd.xlane.f32.xlu0 %v1380_v3 }
 0x9b1   : > { %v1382_v27 = vpop.xlane.xlu0 %1381 }
 0x9b2   : > { %1712 = vmatpush3.msk.msra.mxu0 %vm579_vm11, %v1382_v27 }
 0x9b3   : > { %1714 = vmatmul.mubr.msk.f32.vlgmr.msra.gmra.mxu0 %vm1384_vm5, %v1383_v4 }
 0xa73   : > { %v1457_v15 = vpop.f32.mrf.mxu0 }
 0xa74   : > { %v1461_v7 = vmul.f32 0.2, %v1457_v15 }
 0xa75   : > { %v1715_v8 = vpop.f32.mrf.mxu0 }
 0xa76   : > { %v1462_v10 = vmax.f32 %v1457_v15, %v1461_v7 }
 0xa78   : > { %1717 = vmatpush3.msk.msra.mxu1 %vm579_vm11, %v1462_v10 }
 0xa79   : > { %1719 = vmatmul.mubr.msk.f32.vlgmr.msra.gmra.mxu1 %vm1384_vm5, %v1463_v18 }
 0xb39   : > { %v1536_v21 = vpop.f32.mrf.mxu1 }
 0xb3a   : > { %1542 = vperm.xlu0 %1831, %v1536_v21  }
 0xb3b   : > { %v1720_v1 = vpop.f32.mrf.mxu1 }
 0xbb5   : > { %v1543_v16 = vpop.permute.xlu0 %1542 }
 0xbb6   : > { %v1545_v17 = vadd.f32 %v1543_v16, %v1334_v12  ;;  %v1546_v19 = vadd.f32 %v1543_v16, %v1336_v43 }
 0xbb8   : > { %v1547_v20 = vmul.f32 0.2, %v1545_v17  ;;  %v1548_v26 = vmul.f32 0.2, %v1546_v19 }
 0xbba   : > { %v1549_v30 = vmax.f32 %v1545_v17, %v1547_v20  ;;  %v1550_v23 = vmax.f32 %v1546_v19, %v1548_v26 }
 0xbbc   : > { %v1551_v24 = vadd.f32 %v1549_v30, %v2441_v5  ;;  %v1552_v34 = vadd.f32 %v1550_v23, %v2443_v6 }
 0xbbe   : > { %v1553_v29 = vmul.f32 0.2, %v1551_v24  ;;  %v1554_v25 = vmul.f32 0.2, %v1552_v34 }
 0xbc0   : > { %v1555_v35 = vmax.f32 %v1551_v24, %v1553_v29  ;;  %v1556_v28 = vmax.f32 %v1552_v34, %v1554_v25 }
 0xbc2   : > { %v1559_v31 = vcombine.low %v1555_v35, %v1556_v28 }
 0xbc4   : > { %v1561_v32 = vadd.f32 %v1839_v47, %v1559_v31 }
 0xbc6   : > { %1562 = vst [vmem:[%s346_s6] sm:$0xff] %v1561_v32 }
 0xbc7   : > { %1933 = shalt.err (!%p1930_p12)
}
 0xbc8   : > { %s1934_s14 = scalar_lea.hbm %s1576_s25, 128  ;;  %s1938_s23 = scalar_lea.hbm %s2700_s8, 256 }
 0xbc9   : > { %p1935_p3 = scmp.ne.s32.totalorder %s1576_s25, %s1934_s14  ;;  %p1939_p9 = scmp.lt.s32.totalorder %s1576_s25, %s2700_s8 }
 0xbca   : > { %p1940_p11 = scmp.lt.s32.totalorder %s1938_s23, %s1934_s14 }
 0xbcb   : > { %p1936_p7 = pnand %p1935_p3, %p2721_p0 }
 0xbcc   : > { %p1941_p5 = por %p1940_p11, %p1939_p9 }
 0xbcd   : > { %p1937_p10 = pneg %p1936_p7 }
 0xbcf   : > { %p1942_p13 = pnand %p1941_p5, %p1937_p10 }
 0xbd1   : > { %1945 = shalt.err (!%p1942_p13)
}
 0xbd2   : > { %1731 = dma.vmem_to_hbm [thread:$0]  (%p2721_p0), %s1579_s13, 128, %s1576_s25, %s1564_s26  }
 0xbd3 PF: > { %s1590_s16 = sand.u32 1, %s1976_s27   ;;  %p2722_p1 = scmp.ne.s32.totalorder %s2708_s12, 0 }
 0xbd4   : > { %p2723_p2 = scmp.ge.s32.totalorder %s1988_s30, 2  ;;  %s1591_s6 = scalar_lea.sflag [#allocation4], %s1590_s16 }
 0xbd6   : > { %p1745_p4 = pnand %p2723_p2, %p2722_p1 }
 0xbd8   : > { %p1746_p6 = pneg %p1745_p4 }
 0xbda   : > { %1971 = dma.done.wait (%p1746_p6), %s1591_s6, 128  }
 0xbdb   : > { %1973 = vsyncadd (%p1746_p6), %s1591_s6, 4294967168  ;;  %s2724_s17 = sld [smem:[#allocation12_spill]]  ;;  %p22_p8 = scmp.ge.s32.totalorder %s2110_s19, 4  }
 0xbdc   : > { %s2725_s27 = smov %s1980_s28  ;;  %s2726_s28 = smov %s1984_s29 }
 0xbdd   : > { %s2728_s30 = smov %s2110_s19  ;;  %24 = sbr.rel (!%p22_p8) target bundleno = 9 (0x9), region = 105 }
 0xbe1   : > { %s2727_s29 = smov %s2724_s17 }
 0xbe2   :  { %1596 = vsyncpa [#allocation3], 1 }
 0xbe3   :  { %1598 = vsyncpa [#allocation3 + $0x1], 1 }
 0xbe4   :  { %1599 = vsyncpa [#allocation6], 1 }
 0xbe5   :  { %1600 = vsyncpa [#allocation4], 1 }
 0xbe6   :  { %1602 = vsyncpa [#allocation4 + $0x1], 1 }

</bundles_post_ra>
